<compile_context>
chip_gen: v7x
topology: tpu7x:2x2x1
jax: 0.10.0
libtpu: 0.0.40
codegen_flags: <defaults>
</compile_context>

<pallas_src>
import functools

import jax
import jax.numpy as jnp
from jax.experimental import pallas as pl
from jax.experimental.pallas import tpu as pltpu


def _flash_kernel(q_ref, k_ref, v_ref, o_ref, lse_ref, m_sc, l_sc, acc_sc,
                  *, scaling, num_heads, head_dim, s_total, tk):
    # Block views (per batch b, KV block j):
    #   q_ref : (qs, H*D)   k_ref/v_ref : (tk, H*D)
    #   o_ref : (qs, H*D)   lse_ref     : (qs, H)
    #   m_sc/l_sc : (H, qs, 1)   acc_sc : (H, qs, D)   (persist across the KV axis)
    H, D = num_heads, head_dim
    j = pl.program_id(1)
    nj = pl.num_programs(1)

    @pl.when(j == 0)
    def _init():
        m_sc[...] = jnp.full_like(m_sc, -jnp.inf)
        l_sc[...] = jnp.zeros_like(l_sc)
        acc_sc[...] = jnp.zeros_like(acc_sc)

    # One full-tile load + one scale for all heads (instead of per-head muls).
    q_t = q_ref[...].astype(jnp.float32) * jnp.float32(scaling)   # (qs, H*D)
    k_t = k_ref[...]                                              # (tk, H*D)
    v_t = v_ref[...]                                              # (tk, H*D)
    qs = q_t.shape[0]

    ragged = (s_total % tk) != 0
    if ragged:  # static branch: only traced when the last KV block can be partial
        score_mask = (j * tk + jax.lax.broadcasted_iota(jnp.int32, (qs, tk), 1)) < s_total
        v_mask = (j * tk + jax.lax.broadcasted_iota(jnp.int32, (tk, 1), 0)) < s_total

    # Per-head online softmax; the static loop over heads keeps every op a plain
    # 2-D VMEM op / MXU matmul and amortizes the grid-step overhead over H heads.
    for h in range(H):
        sl = slice(h * D, (h + 1) * D)
        qh = q_t[:, sl]                                        # (qs, D) f32, pre-scaled
        kh = k_t[:, sl].astype(jnp.float32)                    # (tk, D)

        # Q@K^T kept in f32 so log_sum stays at f32-reference accuracy; the NT
        # dot_general avoids materializing k^T.
        scores = jax.lax.dot_general(
            qh, kh, (((1,), (1,)), ((), ())),
            preferred_element_type=jnp.float32)                # (qs, tk)
        if ragged:
            scores = jnp.where(score_mask, scores, -1e30)

        m_prev = m_sc[h]                                       # (qs, 1)
        m_new = jnp.maximum(m_prev, jnp.max(scores, axis=-1, keepdims=True))
        alpha = jnp.exp(m_prev - m_new)
        p = jnp.exp(scores - m_new)                            # (qs, tk)
        l_sc[h] = alpha * l_sc[h] + jnp.sum(p, axis=-1, keepdims=True)
        m_sc[h] = m_new

        vh = v_t[:, sl].astype(jnp.bfloat16)                   # (tk, D)
        if ragged:
            vh = jnp.where(v_mask, vh, 0)      # keep 0 * garbage-padding out of P@V
        # P@V with bf16 operands, f32 accumulation (value output is half precision).
        pv = jnp.dot(p.astype(jnp.bfloat16), vh,
                     preferred_element_type=jnp.float32)       # (qs, D)
        acc_sc[h] = alpha * acc_sc[h] + pv

    @pl.when(j == nj - 1)
    def _finalize():
        outs = []
        lses = []
        for h in range(H):
            l = l_sc[h]                                        # (qs, 1)
            m = m_sc[h]                                        # (qs, 1)
            # One post-PV scale instead of dividing the full (qs, tk) p matrix.
            outs.append(acc_sc[h] * pl.reciprocal(l, approx=True))   # (qs, D)
            lses.append((jnp.log(l) + m) * jnp.float32(1.4427))      # (qs, 1)
        # Single lane-dense (qs, H*D) store for the value; tiny (qs, H) slab for lse.
        o_ref[...] = jnp.concatenate(outs, axis=1).astype(o_ref.dtype)
        lse_ref[...] = jnp.concatenate(lses, axis=1).astype(jnp.float32)


def _build_call(B, qs, s, H, D, tk, scaling, out_dtype, flat_value_out, vmem_limit):
    HD = H * D
    num_kv = pl.cdiv(s, tk)
    kernel = functools.partial(_flash_kernel, scaling=scaling, num_heads=H,
                               head_dim=D, s_total=s, tk=tk)

    if flat_value_out:
        # Value written directly in the final (qs, B*H, D) memory order.
        val_shape = jax.ShapeDtypeStruct((qs, B * HD), out_dtype)
        val_spec = pl.BlockSpec((qs, HD), lambda b, j: (0, b))
    else:
        val_shape = jax.ShapeDtypeStruct((B, qs, HD), out_dtype)
        val_spec = pl.BlockSpec((None, qs, HD), lambda b, j: (b, 0, 0))

    return pl.pallas_call(
        kernel,
        out_shape=(val_shape, jax.ShapeDtypeStruct((B, qs, H), jnp.float32)),
        grid_spec=pltpu.PrefetchScalarGridSpec(
            num_scalar_prefetch=0,
            grid=(B, num_kv),                    # KV (reduction) axis last/innermost
            in_specs=[
                pl.BlockSpec((None, qs, HD), lambda b, j: (b, 0, 0)),  # q (resident over j)
                pl.BlockSpec((None, tk, HD), lambda b, j: (b, j, 0)),  # k
                pl.BlockSpec((None, tk, HD), lambda b, j: (b, j, 0)),  # v
            ],
            out_specs=[
                val_spec,
                pl.BlockSpec((None, qs, H), lambda b, j: (b, 0, 0)),   # lse
            ],
            scratch_shapes=[
                pltpu.VMEM((H, qs, 1), jnp.float32),   # running max
                pltpu.VMEM((H, qs, 1), jnp.float32),   # running sum(exp)
                pltpu.VMEM((H, qs, D), jnp.float32),   # unnormalized output acc
            ],
        ),
        compiler_params=pltpu.CompilerParams(
            dimension_semantics=("parallel", "arbitrary"),
            vmem_limit_bytes=vmem_limit,
        ),
    )


def flash_attn_batch(q, k, v, batch_size, num_heads, head_dim, mask=None):
    """JAX/Pallas equivalent of flashAttnBatch.forward (device != 'cpu' branch)."""
    # TODO(synk): `mask` only drives a torch.nonzero gather in the reference's
    # 'cpu' branch; the accelerator branch (reproduced here) ignores it.
    B, qs, H, D = q.shape
    s = k.shape[1]
    assert (B, H, D) == (batch_size, num_heads, head_dim)
    HD = H * D
    scaling = float(head_dim) ** (-0.5)

    # Free reshapes (adjacent-dim merges): no HBM traffic, no transposes.
    q_r = q.reshape(B, qs, HD)
    k_r = k.reshape(B, s, HD)
    v_r = v.reshape(B, s, HD)

    # KV tile: big enough to amortize the ~600-cycle per-grid-step overhead,
    # small enough that double-buffered K+V tiles fit scoped VMEM everywhere
    # (v5e/v6e: 128 MiB physical, v7x: 64 MiB).
    tk = min(1024, max(8, (2 * 1024 * 1024) // (HD * 4)))
    if tk >= 128:
        tk = (tk // 128) * 128
    tk = int(min(s, tk))

    # Value can be emitted in the final (qs, B*H, D) memory order when the
    # per-batch row chunk (H*D lanes) is 128-aligned (or there is one batch).
    flat_value_out = (HD % 128 == 0) or (B == 1)

    # Scoped-VMEM request: double-buffered tiles + scratch, with headroom.
    tile_bytes = 4 * (2 * qs * HD            # q tile + value tile
                      + 2 * 2 * tk * HD      # k, v (double-buffered)
                      + qs * H               # lse tile
                      + H * qs * (D + 2))    # scratch accumulators
    vmem_limit = int(min(48 * 1024 * 1024, max(32 * 1024 * 1024, 4 * tile_bytes)))

    out_val = out_lse = None
    last_err = None
    for out_dtype in (jnp.float16, jnp.float32):
        try:
            call = _build_call(B, qs, s, H, D, tk, scaling, out_dtype,
                               flat_value_out, vmem_limit)
            out_val, out_lse = call(q_r, k_r, v_r)
            break
        except Exception as e:   # f16 stores unsupported on this Mosaic build -> f32
            last_err = e
            continue
    if out_val is None:
        raise last_err

    if flat_value_out:
        value = out_val.reshape(qs, B * H, D)                     # free reshape
    else:
        value = jnp.transpose(out_val, (1, 0, 2)).reshape(qs, B * H, D)
    value = value.astype(jnp.float16)

    # LSE: (B, qs, H) -> (qs, B*H); tiny tensor, one cheap XLA transpose.
    log_sum = jnp.transpose(out_lse, (1, 0, 2)).reshape(qs, B * H).astype(jnp.float32)
    return value, log_sum


def _reference(q, k, v, batch_size, num_heads, head_dim):
    """Plain-JAX reference mirroring the PyTorch forward (accelerator branch)."""
    B, qs, H, D = q.shape
    s = k.shape[1]
    BH = batch_size * num_heads
    scaling = float(head_dim) ** (-0.5)
    qf = jnp.transpose(q, (0, 2, 1, 3)).reshape(BH, qs, D) * scaling
    kf = jnp.transpose(k, (0, 2, 3, 1)).reshape(BH, D, s)
    vf = jnp.transpose(v, (0, 2, 1, 3)).reshape(BH, s, D)
    aw = jnp.einsum("bqd,bds->bqs", qf, kf)
    m = jnp.max(aw, axis=-1, keepdims=True)
    e = jnp.exp(aw - m)
    se = jnp.sum(e, axis=-1, keepdims=True)
    log_sum = (jnp.log(se) + m) * 1.4427
    p = e / se
    value = jnp.einsum("bqs,bsd->bqd", p, vf)
    value = jnp.transpose(value, (1, 0, 2)).astype(jnp.float16)
    log_sum = jnp.transpose(log_sum[..., 0], (1, 0)).astype(jnp.float32)
    return value, log_sum


if __name__ == "__main__":
    batch_size = 2
    num_heads = 4
    head_dim = 32
    qs = 8
    s = 8

    key = jax.random.PRNGKey(0)
    kq, kk, kv = jax.random.split(key, 3)
    q = jax.random.normal(kq, (batch_size, qs, num_heads, head_dim), dtype=jnp.float32)
    k = jax.random.normal(kk, (batch_size, s, num_heads, head_dim), dtype=jnp.float32)
    v = jax.random.normal(kv, (batch_size, s, num_heads, head_dim), dtype=jnp.float32)

    value, log_sum = flash_attn_batch(q, k, v, batch_size, num_heads, head_dim)
    value = jax.block_until_ready(value)
    log_sum = jax.block_until_ready(log_sum)

    ref_value, ref_log_sum = _reference(q, k, v, batch_size, num_heads, head_dim)
    assert value.shape == (qs, batch_size * num_heads, head_dim) and value.dtype == jnp.float16
    assert log_sum.shape == (qs, batch_size * num_heads) and log_sum.dtype == jnp.float32
    assert jnp.allclose(value.astype(jnp.float32), ref_value.astype(jnp.float32),
                        atol=2e-2, rtol=2e-2)
    assert jnp.allclose(log_sum, ref_log_sum, atol=1e-3, rtol=1e-3)

    print("KERNEL_OK")
</pallas_src>

<mosaic_0001>
module attributes {stable_mosaic.version = 11 : i64} {
  func.func @_flash_kernel(%arg0: i32, %arg1: i32, %arg2: memref<1x8x128xf32, #tpu.memory_space<vmem>>, %arg3: memref<1x8x128xf32, #tpu.memory_space<vmem>>, %arg4: memref<1x8x128xf32, #tpu.memory_space<vmem>>, %arg5: memref<8x128xf16, #tpu.memory_space<vmem>>, %arg6: memref<1x8x4xf32, #tpu.memory_space<vmem>>, %arg7: memref<4x8x1xf32, #tpu.memory_space<vmem>>, %arg8: memref<4x8x1xf32, #tpu.memory_space<vmem>>, %arg9: memref<4x8x32xf32, #tpu.memory_space<vmem>>) attributes {dimension_semantics = [#tpu.dimension_semantics<parallel>, #tpu.dimension_semantics<arbitrary>], iteration_bounds = array<i64: 2, 1>, scalar_prefetch = 0 : i64, scratch_operands = 3 : i64, tpu.core_type = #tpu.core_type<tc>, window_params = [{transform_indices = @transform_0, window_bounds = array<i64: 1, 8, 128>}, {transform_indices = @transform_1, window_bounds = array<i64: 1, 8, 128>}, {transform_indices = @transform_2, window_bounds = array<i64: 1, 8, 128>}, {transform_indices = @transform_3, window_bounds = array<i64: 8, 128>}, {transform_indices = @transform_4, window_bounds = array<i64: 1, 8, 4>}]} {
    %c0_i32 = arith.constant 0 : i32
    %0 = arith.cmpi eq, %arg1, %c0_i32 : i32
    %1 = arith.extui %0 : i1 to i32
    %c0_i32_0 = arith.constant 0 : i32
    %2 = arith.cmpi ne, %1, %c0_i32_0 : i32
    scf.if %2 {
      %cst_96 = arith.constant 0xFF800000 : f32
      %162 = vector.broadcast %cst_96 : f32 to vector<4x8x1xf32>
      %c0_97 = arith.constant 0 : index
      %c0_98 = arith.constant 0 : index
      %c0_99 = arith.constant 0 : index
      %163 = vector.load %arg7[%c0_97, %c0_98, %c0_99] : memref<4x8x1xf32, #tpu.memory_space<vmem>>, vector<4x8x1xf32>
      tpu.vector_store %arg7[%c0_97, %c0_98, %c0_99], %162 {strides = array<i32>} : memref<4x8x1xf32, #tpu.memory_space<vmem>>, vector<4x8x1xf32>,
      %cst_100 = arith.constant 0.000000e+00 : f32
      %164 = vector.broadcast %cst_100 : f32 to vector<4x8x1xf32>
      %c0_101 = arith.constant 0 : index
      %c0_102 = arith.constant 0 : index
      %c0_103 = arith.constant 0 : index
      %165 = vector.load %arg8[%c0_101, %c0_102, %c0_103] : memref<4x8x1xf32, #tpu.memory_space<vmem>>, vector<4x8x1xf32>
      tpu.vector_store %arg8[%c0_101, %c0_102, %c0_103], %164 {strides = array<i32>} : memref<4x8x1xf32, #tpu.memory_space<vmem>>, vector<4x8x1xf32>,
      %cst_104 = arith.constant 0.000000e+00 : f32
      %166 = vector.broadcast %cst_104 : f32 to vector<4x8x32xf32>
      %c0_105 = arith.constant 0 : index
      %c0_106 = arith.constant 0 : index
      %c0_107 = arith.constant 0 : index
      %167 = vector.load %arg9[%c0_105, %c0_106, %c0_107] : memref<4x8x32xf32, #tpu.memory_space<vmem>>, vector<4x8x32xf32>
      tpu.vector_store %arg9[%c0_105, %c0_106, %c0_107], %166 {strides = array<i32>} : memref<4x8x32xf32, #tpu.memory_space<vmem>>, vector<4x8x32xf32>,
    } else {
    }
    %c0 = arith.constant 0 : index
    %c0_1 = arith.constant 0 : index
    %c0_2 = arith.constant 0 : index
    %3 = vector.load %arg2[%c0, %c0_1, %c0_2] : memref<1x8x128xf32, #tpu.memory_space<vmem>>, vector<1x8x128xf32>
    %4 = vector.shape_cast %3 : vector<1x8x128xf32> to vector<8x128xf32>
    %cst = arith.constant 0.176776692 : f32
    %5 = vector.broadcast %cst : f32 to vector<8x128xf32>
    %6 = arith.mulf %4, %5 : vector<8x128xf32>
    %c0_3 = arith.constant 0 : index
    %c0_4 = arith.constant 0 : index
    %c0_5 = arith.constant 0 : index
    %7 = vector.load %arg3[%c0_3, %c0_4, %c0_5] : memref<1x8x128xf32, #tpu.memory_space<vmem>>, vector<1x8x128xf32>
    %8 = vector.shape_cast %7 : vector<1x8x128xf32> to vector<8x128xf32>
    %c0_6 = arith.constant 0 : index
    %c0_7 = arith.constant 0 : index
    %c0_8 = arith.constant 0 : index
    %9 = vector.load %arg4[%c0_6, %c0_7, %c0_8] : memref<1x8x128xf32, #tpu.memory_space<vmem>>, vector<1x8x128xf32>
    %10 = vector.shape_cast %9 : vector<1x8x128xf32> to vector<8x128xf32>
    %11 = vector.extract_strided_slice %6 {offsets = [0, 0], sizes = [8, 32], strides = [1, 1]} : vector<8x128xf32> to vector<8x32xf32>
    %12 = vector.extract_strided_slice %8 {offsets = [0, 0], sizes = [8, 32], strides = [1, 1]} : vector<8x128xf32> to vector<8x32xf32>
    %cst_9 = arith.constant dense<0.000000e+00> : vector<8x8xf32>
    %13 = tpu.matmul %11, %12, %cst_9 {dimension_numbers = #tpu.dot_dimension_numbers<[1], [1], [0], [0], [0, 0, 1, 0], [], []>} : vector<8x32xf32>, vector<8x32xf32>, vector<8x8xf32> -> vector<8x8xf32>
    %c0_10 = arith.constant 0 : index
    %c0_11 = arith.constant 0 : index
    %c0_12 = arith.constant 0 : index
    %14 = vector.load %arg7[%c0_10, %c0_11, %c0_12] : memref<4x8x1xf32, #tpu.memory_space<vmem>>, vector<1x8x1xf32>
    %15 = vector.shape_cast %14 : vector<1x8x1xf32> to vector<8x1xf32>
    %cst_13 = arith.constant dense<0xFF800000> : vector<8xf32>
    %16 = vector.multi_reduction <maximumf>, %13, %cst_13 [1] : vector<8x8xf32> to vector<8xf32>
    %17 = vector.shape_cast %16 : vector<8xf32> to vector<8x1xf32>
    %18 = arith.maximumf %15, %17 : vector<8x1xf32>
    %19 = arith.subf %15, %18 : vector<8x1xf32>
    %20 = math.exp %19 : vector<8x1xf32>
    %21 = vector.broadcast %18 : vector<8x1xf32> to vector<8x8xf32>
    %22 = arith.subf %13, %21 : vector<8x8xf32>
    %23 = math.exp %22 : vector<8x8xf32>
    %c0_14 = arith.constant 0 : index
    %c0_15 = arith.constant 0 : index
    %c0_16 = arith.constant 0 : index
    %24 = vector.load %arg8[%c0_14, %c0_15, %c0_16] : memref<4x8x1xf32, #tpu.memory_space<vmem>>, vector<1x8x1xf32>
    %25 = vector.shape_cast %24 : vector<1x8x1xf32> to vector<8x1xf32>
    %26 = arith.mulf %20, %25 : vector<8x1xf32>
    %cst_17 = arith.constant dense<0.000000e+00> : vector<8xf32>
    %27 = vector.multi_reduction <add>, %23, %cst_17 [1] : vector<8x8xf32> to vector<8xf32>
    %28 = vector.shape_cast %27 : vector<8xf32> to vector<8x1xf32>
    %29 = arith.addf %26, %28 : vector<8x1xf32>
    %c0_18 = arith.constant 0 : index
    %c0_19 = arith.constant 0 : index
    %c0_20 = arith.constant 0 : index
    %30 = vector.load %arg8[%c0_18, %c0_19, %c0_20] : memref<4x8x1xf32, #tpu.memory_space<vmem>>, vector<1x8x1xf32>
    %31 = vector.shape_cast %30 : vector<1x8x1xf32> to vector<8x1xf32>
    %32 = vector.shape_cast %29 : vector<8x1xf32> to vector<1x8x1xf32>
    tpu.vector_store %arg8[%c0_18, %c0_19, %c0_20], %32 {strides = array<i32>} : memref<4x8x1xf32, #tpu.memory_space<vmem>>, vector<1x8x1xf32>,
    %c0_21 = arith.constant 0 : index
    %c0_22 = arith.constant 0 : index
    %c0_23 = arith.constant 0 : index
    %33 = vector.load %arg7[%c0_21, %c0_22, %c0_23] : memref<4x8x1xf32, #tpu.memory_space<vmem>>, vector<1x8x1xf32>
    %34 = vector.shape_cast %33 : vector<1x8x1xf32> to vector<8x1xf32>
    %35 = vector.shape_cast %18 : vector<8x1xf32> to vector<1x8x1xf32>
    tpu.vector_store %arg7[%c0_21, %c0_22, %c0_23], %35 {strides = array<i32>} : memref<4x8x1xf32, #tpu.memory_space<vmem>>, vector<1x8x1xf32>,
    %36 = vector.extract_strided_slice %10 {offsets = [0, 0], sizes = [8, 32], strides = [1, 1]} : vector<8x128xf32> to vector<8x32xf32>
    %37 = arith.truncf %36 : vector<8x32xf32> to vector<8x32xbf16>
    %38 = arith.truncf %23 : vector<8x8xf32> to vector<8x8xbf16>
    %cst_24 = arith.constant dense<0.000000e+00> : vector<8x32xf32>
    %39 = tpu.matmul %38, %37, %cst_24 {dimension_numbers = #tpu.dot_dimension_numbers<[1], [0], [0], [1], [0, 0, 1, 1], [], []>} : vector<8x8xbf16>, vector<8x32xbf16>, vector<8x32xf32> -> vector<8x32xf32>
    %c0_25 = arith.constant 0 : index
    %c0_26 = arith.constant 0 : index
    %c0_27 = arith.constant 0 : index
    %40 = vector.load %arg9[%c0_25, %c0_26, %c0_27] : memref<4x8x32xf32, #tpu.memory_space<vmem>>, vector<1x8x32xf32>
    %41 = vector.shape_cast %40 : vector<1x8x32xf32> to vector<8x32xf32>
    %42 = vector.broadcast %20 : vector<8x1xf32> to vector<8x32xf32>
    %43 = arith.mulf %42, %41 : vector<8x32xf32>
    %44 = arith.addf %43, %39 : vector<8x32xf32>
    %c0_28 = arith.constant 0 : index
    %c0_29 = arith.constant 0 : index
    %c0_30 = arith.constant 0 : index
    %45 = vector.load %arg9[%c0_28, %c0_29, %c0_30] : memref<4x8x32xf32, #tpu.memory_space<vmem>>, vector<1x8x32xf32>
    %46 = vector.shape_cast %45 : vector<1x8x32xf32> to vector<8x32xf32>
    %47 = vector.shape_cast %44 : vector<8x32xf32> to vector<1x8x32xf32>
    tpu.vector_store %arg9[%c0_28, %c0_29, %c0_30], %47 {strides = array<i32>} : memref<4x8x32xf32, #tpu.memory_space<vmem>>, vector<1x8x32xf32>,
    %48 = vector.extract_strided_slice %6 {offsets = [0, 32], sizes = [8, 32], strides = [1, 1]} : vector<8x128xf32> to vector<8x32xf32>
    %49 = vector.extract_strided_slice %8 {offsets = [0, 32], sizes = [8, 32], strides = [1, 1]} : vector<8x128xf32> to vector<8x32xf32>
    %cst_31 = arith.constant dense<0.000000e+00> : vector<8x8xf32>
    %50 = tpu.matmul %48, %49, %cst_31 {dimension_numbers = #tpu.dot_dimension_numbers<[1], [1], [0], [0], [0, 0, 1, 0], [], []>} : vector<8x32xf32>, vector<8x32xf32>, vector<8x8xf32> -> vector<8x8xf32>
    %c1 = arith.constant 1 : index
    %c0_32 = arith.constant 0 : index
    %c0_33 = arith.constant 0 : index
    %51 = vector.load %arg7[%c1, %c0_32, %c0_33] : memref<4x8x1xf32, #tpu.memory_space<vmem>>, vector<1x8x1xf32>
    %52 = vector.shape_cast %51 : vector<1x8x1xf32> to vector<8x1xf32>
    %cst_34 = arith.constant dense<0xFF800000> : vector<8xf32>
    %53 = vector.multi_reduction <maximumf>, %50, %cst_34 [1] : vector<8x8xf32> to vector<8xf32>
    %54 = vector.shape_cast %53 : vector<8xf32> to vector<8x1xf32>
    %55 = arith.maximumf %52, %54 : vector<8x1xf32>
    %56 = arith.subf %52, %55 : vector<8x1xf32>
    %57 = math.exp %56 : vector<8x1xf32>
    %58 = vector.broadcast %55 : vector<8x1xf32> to vector<8x8xf32>
    %59 = arith.subf %50, %58 : vector<8x8xf32>
    %60 = math.exp %59 : vector<8x8xf32>
    %c1_35 = arith.constant 1 : index
    %c0_36 = arith.constant 0 : index
    %c0_37 = arith.constant 0 : index
    %61 = vector.load %arg8[%c1_35, %c0_36, %c0_37] : memref<4x8x1xf32, #tpu.memory_space<vmem>>, vector<1x8x1xf32>
    %62 = vector.shape_cast %61 : vector<1x8x1xf32> to vector<8x1xf32>
    %63 = arith.mulf %57, %62 : vector<8x1xf32>
    %cst_38 = arith.constant dense<0.000000e+00> : vector<8xf32>
    %64 = vector.multi_reduction <add>, %60, %cst_38 [1] : vector<8x8xf32> to vector<8xf32>
    %65 = vector.shape_cast %64 : vector<8xf32> to vector<8x1xf32>
    %66 = arith.addf %63, %65 : vector<8x1xf32>
    %c1_39 = arith.constant 1 : index
    %c0_40 = arith.constant 0 : index
    %c0_41 = arith.constant 0 : index
    %67 = vector.load %arg8[%c1_39, %c0_40, %c0_41] : memref<4x8x1xf32, #tpu.memory_space<vmem>>, vector<1x8x1xf32>
    %68 = vector.shape_cast %67 : vector<1x8x1xf32> to vector<8x1xf32>
    %69 = vector.shape_cast %66 : vector<8x1xf32> to vector<1x8x1xf32>
    tpu.vector_store %arg8[%c1_39, %c0_40, %c0_41], %69 {strides = array<i32>} : memref<4x8x1xf32, #tpu.memory_space<vmem>>, vector<1x8x1xf32>,
    %c1_42 = arith.constant 1 : index
    %c0_43 = arith.constant 0 : index
    %c0_44 = arith.constant 0 : index
    %70 = vector.load %arg7[%c1_42, %c0_43, %c0_44] : memref<4x8x1xf32, #tpu.memory_space<vmem>>, vector<1x8x1xf32>
    %71 = vector.shape_cast %70 : vector<1x8x1xf32> to vector<8x1xf32>
    %72 = vector.shape_cast %55 : vector<8x1xf32> to vector<1x8x1xf32>
    tpu.vector_store %arg7[%c1_42, %c0_43, %c0_44], %72 {strides = array<i32>} : memref<4x8x1xf32, #tpu.memory_space<vmem>>, vector<1x8x1xf32>,
    %73 = vector.extract_strided_slice %10 {offsets = [0, 32], sizes = [8, 32], strides = [1, 1]} : vector<8x128xf32> to vector<8x32xf32>
    %74 = arith.truncf %73 : vector<8x32xf32> to vector<8x32xbf16>
    %75 = arith.truncf %60 : vector<8x8xf32> to vector<8x8xbf16>
    %cst_45 = arith.constant dense<0.000000e+00> : vector<8x32xf32>
    %76 = tpu.matmul %75, %74, %cst_45 {dimension_numbers = #tpu.dot_dimension_numbers<[1], [0], [0], [1], [0, 0, 1, 1], [], []>} : vector<8x8xbf16>, vector<8x32xbf16>, vector<8x32xf32> -> vector<8x32xf32>
    %c1_46 = arith.constant 1 : index
    %c0_47 = arith.constant 0 : index
    %c0_48 = arith.constant 0 : index
    %77 = vector.load %arg9[%c1_46, %c0_47, %c0_48] : memref<4x8x32xf32, #tpu.memory_space<vmem>>, vector<1x8x32xf32>
    %78 = vector.shape_cast %77 : vector<1x8x32xf32> to vector<8x32xf32>
    %79 = vector.broadcast %57 : vector<8x1xf32> to vector<8x32xf32>
    %80 = arith.mulf %79, %78 : vector<8x32xf32>
    %81 = arith.addf %80, %76 : vector<8x32xf32>
    %c1_49 = arith.constant 1 : index
    %c0_50 = arith.constant 0 : index
    %c0_51 = arith.constant 0 : index
    %82 = vector.load %arg9[%c1_49, %c0_50, %c0_51] : memref<4x8x32xf32, #tpu.memory_space<vmem>>, vector<1x8x32xf32>
    %83 = vector.shape_cast %82 : vector<1x8x32xf32> to vector<8x32xf32>
    %84 = vector.shape_cast %81 : vector<8x32xf32> to vector<1x8x32xf32>
    tpu.vector_store %arg9[%c1_49, %c0_50, %c0_51], %84 {strides = array<i32>} : memref<4x8x32xf32, #tpu.memory_space<vmem>>, vector<1x8x32xf32>,
    %85 = vector.extract_strided_slice %6 {offsets = [0, 64], sizes = [8, 32], strides = [1, 1]} : vector<8x128xf32> to vector<8x32xf32>
    %86 = vector.extract_strided_slice %8 {offsets = [0, 64], sizes = [8, 32], strides = [1, 1]} : vector<8x128xf32> to vector<8x32xf32>
    %cst_52 = arith.constant dense<0.000000e+00> : vector<8x8xf32>
    %87 = tpu.matmul %85, %86, %cst_52 {dimension_numbers = #tpu.dot_dimension_numbers<[1], [1], [0], [0], [0, 0, 1, 0], [], []>} : vector<8x32xf32>, vector<8x32xf32>, vector<8x8xf32> -> vector<8x8xf32>
    %c2 = arith.constant 2 : index
    %c0_53 = arith.constant 0 : index
    %c0_54 = arith.constant 0 : index
    %88 = vector.load %arg7[%c2, %c0_53, %c0_54] : memref<4x8x1xf32, #tpu.memory_space<vmem>>, vector<1x8x1xf32>
    %89 = vector.shape_cast %88 : vector<1x8x1xf32> to vector<8x1xf32>
    %cst_55 = arith.constant dense<0xFF800000> : vector<8xf32>
    %90 = vector.multi_reduction <maximumf>, %87, %cst_55 [1] : vector<8x8xf32> to vector<8xf32>
    %91 = vector.shape_cast %90 : vector<8xf32> to vector<8x1xf32>
    %92 = arith.maximumf %89, %91 : vector<8x1xf32>
    %93 = arith.subf %89, %92 : vector<8x1xf32>
    %94 = math.exp %93 : vector<8x1xf32>
    %95 = vector.broadcast %92 : vector<8x1xf32> to vector<8x8xf32>
    %96 = arith.subf %87, %95 : vector<8x8xf32>
    %97 = math.exp %96 : vector<8x8xf32>
    %c2_56 = arith.constant 2 : index
    %c0_57 = arith.constant 0 : index
    %c0_58 = arith.constant 0 : index
    %98 = vector.load %arg8[%c2_56, %c0_57, %c0_58] : memref<4x8x1xf32, #tpu.memory_space<vmem>>, vector<1x8x1xf32>
    %99 = vector.shape_cast %98 : vector<1x8x1xf32> to vector<8x1xf32>
    %100 = arith.mulf %94, %99 : vector<8x1xf32>
    %cst_59 = arith.constant dense<0.000000e+00> : vector<8xf32>
    %101 = vector.multi_reduction <add>, %97, %cst_59 [1] : vector<8x8xf32> to vector<8xf32>
    %102 = vector.shape_cast %101 : vector<8xf32> to vector<8x1xf32>
    %103 = arith.addf %100, %102 : vector<8x1xf32>
    %c2_60 = arith.constant 2 : index
    %c0_61 = arith.constant 0 : index
    %c0_62 = arith.constant 0 : index
    %104 = vector.load %arg8[%c2_60, %c0_61, %c0_62] : memref<4x8x1xf32, #tpu.memory_space<vmem>>, vector<1x8x1xf32>
    %105 = vector.shape_cast %104 : vector<1x8x1xf32> to vector<8x1xf32>
    %106 = vector.shape_cast %103 : vector<8x1xf32> to vector<1x8x1xf32>
    tpu.vector_store %arg8[%c2_60, %c0_61, %c0_62], %106 {strides = array<i32>} : memref<4x8x1xf32, #tpu.memory_space<vmem>>, vector<1x8x1xf32>,
    %c2_63 = arith.constant 2 : index
    %c0_64 = arith.constant 0 : index
    %c0_65 = arith.constant 0 : index
    %107 = vector.load %arg7[%c2_63, %c0_64, %c0_65] : memref<4x8x1xf32, #tpu.memory_space<vmem>>, vector<1x8x1xf32>
    %108 = vector.shape_cast %107 : vector<1x8x1xf32> to vector<8x1xf32>
    %109 = vector.shape_cast %92 : vector<8x1xf32> to vector<1x8x1xf32>
    tpu.vector_store %arg7[%c2_63, %c0_64, %c0_65], %109 {strides = array<i32>} : memref<4x8x1xf32, #tpu.memory_space<vmem>>, vector<1x8x1xf32>,
    %110 = vector.extract_strided_slice %10 {offsets = [0, 64], sizes = [8, 32], strides = [1, 1]} : vector<8x128xf32> to vector<8x32xf32>
    %111 = arith.truncf %110 : vector<8x32xf32> to vector<8x32xbf16>
    %112 = arith.truncf %97 : vector<8x8xf32> to vector<8x8xbf16>
    %cst_66 = arith.constant dense<0.000000e+00> : vector<8x32xf32>
    %113 = tpu.matmul %112, %111, %cst_66 {dimension_numbers = #tpu.dot_dimension_numbers<[1], [0], [0], [1], [0, 0, 1, 1], [], []>} : vector<8x8xbf16>, vector<8x32xbf16>, vector<8x32xf32> -> vector<8x32xf32>
    %c2_67 = arith.constant 2 : index
    %c0_68 = arith.constant 0 : index
    %c0_69 = arith.constant 0 : index
    %114 = vector.load %arg9[%c2_67, %c0_68, %c0_69] : memref<4x8x32xf32, #tpu.memory_space<vmem>>, vector<1x8x32xf32>
    %115 = vector.shape_cast %114 : vector<1x8x32xf32> to vector<8x32xf32>
    %116 = vector.broadcast %94 : vector<8x1xf32> to vector<8x32xf32>
    %117 = arith.mulf %116, %115 : vector<8x32xf32>
    %118 = arith.addf %117, %113 : vector<8x32xf32>
    %c2_70 = arith.constant 2 : index
    %c0_71 = arith.constant 0 : index
    %c0_72 = arith.constant 0 : index
    %119 = vector.load %arg9[%c2_70, %c0_71, %c0_72] : memref<4x8x32xf32, #tpu.memory_space<vmem>>, vector<1x8x32xf32>
    %120 = vector.shape_cast %119 : vector<1x8x32xf32> to vector<8x32xf32>
    %121 = vector.shape_cast %118 : vector<8x32xf32> to vector<1x8x32xf32>
    tpu.vector_store %arg9[%c2_70, %c0_71, %c0_72], %121 {strides = array<i32>} : memref<4x8x32xf32, #tpu.memory_space<vmem>>, vector<1x8x32xf32>,
    %122 = vector.extract_strided_slice %6 {offsets = [0, 96], sizes = [8, 32], strides = [1, 1]} : vector<8x128xf32> to vector<8x32xf32>
    %123 = vector.extract_strided_slice %8 {offsets = [0, 96], sizes = [8, 32], strides = [1, 1]} : vector<8x128xf32> to vector<8x32xf32>
    %cst_73 = arith.constant dense<0.000000e+00> : vector<8x8xf32>
    %124 = tpu.matmul %122, %123, %cst_73 {dimension_numbers = #tpu.dot_dimension_numbers<[1], [1], [0], [0], [0, 0, 1, 0], [], []>} : vector<8x32xf32>, vector<8x32xf32>, vector<8x8xf32> -> vector<8x8xf32>
    %c3 = arith.constant 3 : index
    %c0_74 = arith.constant 0 : index
    %c0_75 = arith.constant 0 : index
    %125 = vector.load %arg7[%c3, %c0_74, %c0_75] : memref<4x8x1xf32, #tpu.memory_space<vmem>>, vector<1x8x1xf32>
    %126 = vector.shape_cast %125 : vector<1x8x1xf32> to vector<8x1xf32>
    %cst_76 = arith.constant dense<0xFF800000> : vector<8xf32>
    %127 = vector.multi_reduction <maximumf>, %124, %cst_76 [1] : vector<8x8xf32> to vector<8xf32>
    %128 = vector.shape_cast %127 : vector<8xf32> to vector<8x1xf32>
    %129 = arith.maximumf %126, %128 : vector<8x1xf32>
    %130 = arith.subf %126, %129 : vector<8x1xf32>
    %131 = math.exp %130 : vector<8x1xf32>
    %132 = vector.broadcast %129 : vector<8x1xf32> to vector<8x8xf32>
    %133 = arith.subf %124, %132 : vector<8x8xf32>
    %134 = math.exp %133 : vector<8x8xf32>
    %c3_77 = arith.constant 3 : index
    %c0_78 = arith.constant 0 : index
    %c0_79 = arith.constant 0 : index
    %135 = vector.load %arg8[%c3_77, %c0_78, %c0_79] : memref<4x8x1xf32, #tpu.memory_space<vmem>>, vector<1x8x1xf32>
    %136 = vector.shape_cast %135 : vector<1x8x1xf32> to vector<8x1xf32>
    %137 = arith.mulf %131, %136 : vector<8x1xf32>
    %cst_80 = arith.constant dense<0.000000e+00> : vector<8xf32>
    %138 = vector.multi_reduction <add>, %134, %cst_80 [1] : vector<8x8xf32> to vector<8xf32>
    %139 = vector.shape_cast %138 : vector<8xf32> to vector<8x1xf32>
    %140 = arith.addf %137, %139 : vector<8x1xf32>
    %c3_81 = arith.constant 3 : index
    %c0_82 = arith.constant 0 : index
    %c0_83 = arith.constant 0 : index
    %141 = vector.load %arg8[%c3_81, %c0_82, %c0_83] : memref<4x8x1xf32, #tpu.memory_space<vmem>>, vector<1x8x1xf32>
    %142 = vector.shape_cast %141 : vector<1x8x1xf32> to vector<8x1xf32>
    %143 = vector.shape_cast %140 : vector<8x1xf32> to vector<1x8x1xf32>
    tpu.vector_store %arg8[%c3_81, %c0_82, %c0_83], %143 {strides = array<i32>} : memref<4x8x1xf32, #tpu.memory_space<vmem>>, vector<1x8x1xf32>,
    %c3_84 = arith.constant 3 : index
    %c0_85 = arith.constant 0 : index
    %c0_86 = arith.constant 0 : index
    %144 = vector.load %arg7[%c3_84, %c0_85, %c0_86] : memref<4x8x1xf32, #tpu.memory_space<vmem>>, vector<1x8x1xf32>
    %145 = vector.shape_cast %144 : vector<1x8x1xf32> to vector<8x1xf32>
    %146 = vector.shape_cast %129 : vector<8x1xf32> to vector<1x8x1xf32>
    tpu.vector_store %arg7[%c3_84, %c0_85, %c0_86], %146 {strides = array<i32>} : memref<4x8x1xf32, #tpu.memory_space<vmem>>, vector<1x8x1xf32>,
    %147 = vector.extract_strided_slice %10 {offsets = [0, 96], sizes = [8, 32], strides = [1, 1]} : vector<8x128xf32> to vector<8x32xf32>
    %148 = arith.truncf %147 : vector<8x32xf32> to vector<8x32xbf16>
    %149 = arith.truncf %134 : vector<8x8xf32> to vector<8x8xbf16>
    %cst_87 = arith.constant dense<0.000000e+00> : vector<8x32xf32>
    %150 = tpu.matmul %149, %148, %cst_87 {dimension_numbers = #tpu.dot_dimension_numbers<[1], [0], [0], [1], [0, 0, 1, 1], [], []>} : vector<8x8xbf16>, vector<8x32xbf16>, vector<8x32xf32> -> vector<8x32xf32>
    %c3_88 = arith.constant 3 : index
    %c0_89 = arith.constant 0 : index
    %c0_90 = arith.constant 0 : index
    %151 = vector.load %arg9[%c3_88, %c0_89, %c0_90] : memref<4x8x32xf32, #tpu.memory_space<vmem>>, vector<1x8x32xf32>
    %152 = vector.shape_cast %151 : vector<1x8x32xf32> to vector<8x32xf32>
    %153 = vector.broadcast %131 : vector<8x1xf32> to vector<8x32xf32>
    %154 = arith.mulf %153, %152 : vector<8x32xf32>
    %155 = arith.addf %154, %150 : vector<8x32xf32>
    %c3_91 = arith.constant 3 : index
    %c0_92 = arith.constant 0 : index
    %c0_93 = arith.constant 0 : index
    %156 = vector.load %arg9[%c3_91, %c0_92, %c0_93] : memref<4x8x32xf32, #tpu.memory_space<vmem>>, vector<1x8x32xf32>
    %157 = vector.shape_cast %156 : vector<1x8x32xf32> to vector<8x32xf32>
    %158 = vector.shape_cast %155 : vector<8x32xf32> to vector<1x8x32xf32>
    tpu.vector_store %arg9[%c3_91, %c0_92, %c0_93], %158 {strides = array<i32>} : memref<4x8x32xf32, #tpu.memory_space<vmem>>, vector<1x8x32xf32>,
    %c0_i32_94 = arith.constant 0 : i32
    %159 = arith.cmpi eq, %arg1, %c0_i32_94 : i32
    %160 = arith.extui %159 : i1 to i32
    %c0_i32_95 = arith.constant 0 : i32
    %161 = arith.cmpi ne, %160, %c0_i32_95 : i32
    scf.if %161 {
      %c0_96 = arith.constant 0 : index
      %c0_97 = arith.constant 0 : index
      %c0_98 = arith.constant 0 : index
      %162 = vector.load %arg8[%c0_96, %c0_97, %c0_98] : memref<4x8x1xf32, #tpu.memory_space<vmem>>, vector<1x8x1xf32>
      %163 = vector.shape_cast %162 : vector<1x8x1xf32> to vector<8x1xf32>
      %c0_99 = arith.constant 0 : index
      %c0_100 = arith.constant 0 : index
      %c0_101 = arith.constant 0 : index
      %164 = vector.load %arg7[%c0_99, %c0_100, %c0_101] : memref<4x8x1xf32, #tpu.memory_space<vmem>>, vector<1x8x1xf32>
      %165 = vector.shape_cast %164 : vector<1x8x1xf32> to vector<8x1xf32>
      %c0_102 = arith.constant 0 : index
      %c0_103 = arith.constant 0 : index
      %c0_104 = arith.constant 0 : index
      %166 = vector.load %arg9[%c0_102, %c0_103, %c0_104] : memref<4x8x32xf32, #tpu.memory_space<vmem>>, vector<1x8x32xf32>
      %167 = vector.shape_cast %166 : vector<1x8x32xf32> to vector<8x32xf32>
      %168 = tpu.reciprocal %163 {approx = true} : vector<8x1xf32> -> vector<8x1xf32>
      %169 = vector.broadcast %168 : vector<8x1xf32> to vector<8x32xf32>
      %170 = arith.mulf %167, %169 : vector<8x32xf32>
      %171 = math.log %163 : vector<8x1xf32>
      %172 = arith.addf %171, %165 : vector<8x1xf32>
      %cst_105 = arith.constant 1.442700e+00 : f32
      %173 = vector.broadcast %cst_105 : f32 to vector<8x1xf32>
      %174 = arith.mulf %172, %173 : vector<8x1xf32>
      %c1_106 = arith.constant 1 : index
      %c0_107 = arith.constant 0 : index
      %c0_108 = arith.constant 0 : index
      %175 = vector.load %arg8[%c1_106, %c0_107, %c0_108] : memref<4x8x1xf32, #tpu.memory_space<vmem>>, vector<1x8x1xf32>
      %176 = vector.shape_cast %175 : vector<1x8x1xf32> to vector<8x1xf32>
      %c1_109 = arith.constant 1 : index
      %c0_110 = arith.constant 0 : index
      %c0_111 = arith.constant 0 : index
      %177 = vector.load %arg7[%c1_109, %c0_110, %c0_111] : memref<4x8x1xf32, #tpu.memory_space<vmem>>, vector<1x8x1xf32>
      %178 = vector.shape_cast %177 : vector<1x8x1xf32> to vector<8x1xf32>
      %c1_112 = arith.constant 1 : index
      %c0_113 = arith.constant 0 : index
      %c0_114 = arith.constant 0 : index
      %179 = vector.load %arg9[%c1_112, %c0_113, %c0_114] : memref<4x8x32xf32, #tpu.memory_space<vmem>>, vector<1x8x32xf32>
      %180 = vector.shape_cast %179 : vector<1x8x32xf32> to vector<8x32xf32>
      %181 = tpu.reciprocal %176 {approx = true} : vector<8x1xf32> -> vector<8x1xf32>
      %182 = vector.broadcast %181 : vector<8x1xf32> to vector<8x32xf32>
      %183 = arith.mulf %180, %182 : vector<8x32xf32>
      %184 = math.log %176 : vector<8x1xf32>
      %185 = arith.addf %184, %178 : vector<8x1xf32>
      %cst_115 = arith.constant 1.442700e+00 : f32
      %186 = vector.broadcast %cst_115 : f32 to vector<8x1xf32>
      %187 = arith.mulf %185, %186 : vector<8x1xf32>
      %c2_116 = arith.constant 2 : index
      %c0_117 = arith.constant 0 : index
      %c0_118 = arith.constant 0 : index
      %188 = vector.load %arg8[%c2_116, %c0_117, %c0_118] : memref<4x8x1xf32, #tpu.memory_space<vmem>>, vector<1x8x1xf32>
      %189 = vector.shape_cast %188 : vector<1x8x1xf32> to vector<8x1xf32>
      %c2_119 = arith.constant 2 : index
      %c0_120 = arith.constant 0 : index
      %c0_121 = arith.constant 0 : index
      %190 = vector.load %arg7[%c2_119, %c0_120, %c0_121] : memref<4x8x1xf32, #tpu.memory_space<vmem>>, vector<1x8x1xf32>
      %191 = vector.shape_cast %190 : vector<1x8x1xf32> to vector<8x1xf32>
      %c2_122 = arith.constant 2 : index
      %c0_123 = arith.constant 0 : index
      %c0_124 = arith.constant 0 : index
      %192 = vector.load %arg9[%c2_122, %c0_123, %c0_124] : memref<4x8x32xf32, #tpu.memory_space<vmem>>, vector<1x8x32xf32>
      %193 = vector.shape_cast %192 : vector<1x8x32xf32> to vector<8x32xf32>
      %194 = tpu.reciprocal %189 {approx = true} : vector<8x1xf32> -> vector<8x1xf32>
      %195 = vector.broadcast %194 : vector<8x1xf32> to vector<8x32xf32>
      %196 = arith.mulf %193, %195 : vector<8x32xf32>
      %197 = math.log %189 : vector<8x1xf32>
      %198 = arith.addf %197, %191 : vector<8x1xf32>
      %cst_125 = arith.constant 1.442700e+00 : f32
      %199 = vector.broadcast %cst_125 : f32 to vector<8x1xf32>
      %200 = arith.mulf %198, %199 : vector<8x1xf32>
      %c3_126 = arith.constant 3 : index
      %c0_127 = arith.constant 0 : index
      %c0_128 = arith.constant 0 : index
      %201 = vector.load %arg8[%c3_126, %c0_127, %c0_128] : memref<4x8x1xf32, #tpu.memory_space<vmem>>, vector<1x8x1xf32>
      %202 = vector.shape_cast %201 : vector<1x8x1xf32> to vector<8x1xf32>
      %c3_129 = arith.constant 3 : index
      %c0_130 = arith.constant 0 : index
      %c0_131 = arith.constant 0 : index
      %203 = vector.load %arg7[%c3_129, %c0_130, %c0_131] : memref<4x8x1xf32, #tpu.memory_space<vmem>>, vector<1x8x1xf32>
      %204 = vector.shape_cast %203 : vector<1x8x1xf32> to vector<8x1xf32>
      %c3_132 = arith.constant 3 : index
      %c0_133 = arith.constant 0 : index
      %c0_134 = arith.constant 0 : index
      %205 = vector.load %arg9[%c3_132, %c0_133, %c0_134] : memref<4x8x32xf32, #tpu.memory_space<vmem>>, vector<1x8x32xf32>
      %206 = vector.shape_cast %205 : vector<1x8x32xf32> to vector<8x32xf32>
      %207 = tpu.reciprocal %202 {approx = true} : vector<8x1xf32> -> vector<8x1xf32>
      %208 = vector.broadcast %207 : vector<8x1xf32> to vector<8x32xf32>
      %209 = arith.mulf %206, %208 : vector<8x32xf32>
      %210 = math.log %202 : vector<8x1xf32>
      %211 = arith.addf %210, %204 : vector<8x1xf32>
      %cst_135 = arith.constant 1.442700e+00 : f32
      %212 = vector.broadcast %cst_135 : f32 to vector<8x1xf32>
      %213 = arith.mulf %211, %212 : vector<8x1xf32>
      %214 = tpu.concatenate %170, %183, %196, %209 in 1 : vector<8x32xf32>, vector<8x32xf32>, vector<8x32xf32>, vector<8x32xf32> -> vector<8x128xf32>
      %215 = arith.truncf %214 : vector<8x128xf32> to vector<8x128xf16>
      %c0_136 = arith.constant 0 : index
      %c0_137 = arith.constant 0 : index
      %216 = vector.load %arg5[%c0_136, %c0_137] : memref<8x128xf16, #tpu.memory_space<vmem>>, vector<8x128xf16>
      tpu.vector_store %arg5[%c0_136, %c0_137], %215 {strides = array<i32>} : memref<8x128xf16, #tpu.memory_space<vmem>>, vector<8x128xf16>,
      %217 = tpu.concatenate %174, %187, %200, %213 in 1 : vector<8x1xf32>, vector<8x1xf32>, vector<8x1xf32>, vector<8x1xf32> -> vector<8x4xf32>
      %c0_138 = arith.constant 0 : index
      %c0_139 = arith.constant 0 : index
      %c0_140 = arith.constant 0 : index
      %218 = vector.load %arg6[%c0_138, %c0_139, %c0_140] : memref<1x8x4xf32, #tpu.memory_space<vmem>>, vector<1x8x4xf32>
      %219 = vector.shape_cast %218 : vector<1x8x4xf32> to vector<8x4xf32>
      %220 = vector.shape_cast %217 : vector<8x4xf32> to vector<1x8x4xf32>
      tpu.vector_store %arg6[%c0_138, %c0_139, %c0_140], %220 {strides = array<i32>} : memref<1x8x4xf32, #tpu.memory_space<vmem>>, vector<1x8x4xf32>,
    } else {
    }
    return
  }
  func.func @transform_0(%arg0: i32, %arg1: i32) -> (i32, i32, i32) {
    %c0_i32 = arith.constant 0 : i32
    %c0_i32_0 = arith.constant 0 : i32
    %c0_i32_1 = arith.constant 0 : i32
    return %arg0, %c0_i32, %c0_i32_0 : i32, i32, i32
  }
  func.func @transform_1(%arg0: i32, %arg1: i32) -> (i32, i32, i32) {
    %c0_i32 = arith.constant 0 : i32
    %c0_i32_0 = arith.constant 0 : i32
    return %arg0, %arg1, %c0_i32 : i32, i32, i32
  }
  func.func @transform_2(%arg0: i32, %arg1: i32) -> (i32, i32, i32) {
    %c0_i32 = arith.constant 0 : i32
    %c0_i32_0 = arith.constant 0 : i32
    return %arg0, %arg1, %c0_i32 : i32, i32, i32
  }
  func.func @transform_3(%arg0: i32, %arg1: i32) -> (i32, i32) {
    %c0_i32 = arith.constant 0 : i32
    %c0_i32_0 = arith.constant 0 : i32
    return %c0_i32, %arg0 : i32, i32
  }
  func.func @transform_4(%arg0: i32, %arg1: i32) -> (i32, i32, i32) {
    %c0_i32 = arith.constant 0 : i32
    %c0_i32_0 = arith.constant 0 : i32
    %c0_i32_1 = arith.constant 0 : i32
    return %arg0, %c0_i32, %c0_i32_0 : i32, i32, i32
  }
}

module attributes {stable_mosaic.version = 11 : i64} {
  func.func @_flash_kernel(%arg0: i32, %arg1: i32, %arg2: memref<1x8x128xf32, #tpu.memory_space<vmem>>, %arg3: memref<1x8x128xf32, #tpu.memory_space<vmem>>, %arg4: memref<1x8x128xf32, #tpu.memory_space<vmem>>, %arg5: memref<8x128xf32, #tpu.memory_space<vmem>>, %arg6: memref<1x8x4xf32, #tpu.memory_space<vmem>>, %arg7: memref<4x8x1xf32, #tpu.memory_space<vmem>>, %arg8: memref<4x8x1xf32, #tpu.memory_space<vmem>>, %arg9: memref<4x8x32xf32, #tpu.memory_space<vmem>>) attributes {dimension_semantics = [#tpu.dimension_semantics<parallel>, #tpu.dimension_semantics<arbitrary>], iteration_bounds = array<i64: 2, 1>, scalar_prefetch = 0 : i64, scratch_operands = 3 : i64, tpu.core_type = #tpu.core_type<tc>, window_params = [{transform_indices = @transform_0, window_bounds = array<i64: 1, 8, 128>}, {transform_indices = @transform_1, window_bounds = array<i64: 1, 8, 128>}, {transform_indices = @transform_2, window_bounds = array<i64: 1, 8, 128>}, {transform_indices = @transform_3, window_bounds = array<i64: 8, 128>}, {transform_indices = @transform_4, window_bounds = array<i64: 1, 8, 4>}]} {
    %c0_i32 = arith.constant 0 : i32
    %0 = arith.cmpi eq, %arg1, %c0_i32 : i32
    %1 = arith.extui %0 : i1 to i32
    %c0_i32_0 = arith.constant 0 : i32
    %2 = arith.cmpi ne, %1, %c0_i32_0 : i32
    scf.if %2 {
      %cst_96 = arith.constant 0xFF800000 : f32
      %162 = vector.broadcast %cst_96 : f32 to vector<4x8x1xf32>
      %c0_97 = arith.constant 0 : index
      %c0_98 = arith.constant 0 : index
      %c0_99 = arith.constant 0 : index
      %163 = vector.load %arg7[%c0_97, %c0_98, %c0_99] : memref<4x8x1xf32, #tpu.memory_space<vmem>>, vector<4x8x1xf32>
      tpu.vector_store %arg7[%c0_97, %c0_98, %c0_99], %162 {strides = array<i32>} : memref<4x8x1xf32, #tpu.memory_space<vmem>>, vector<4x8x1xf32>,
      %cst_100 = arith.constant 0.000000e+00 : f32
      %164 = vector.broadcast %cst_100 : f32 to vector<4x8x1xf32>
      %c0_101 = arith.constant 0 : index
      %c0_102 = arith.constant 0 : index
      %c0_103 = arith.constant 0 : index
      %165 = vector.load %arg8[%c0_101, %c0_102, %c0_103] : memref<4x8x1xf32, #tpu.memory_space<vmem>>, vector<4x8x1xf32>
      tpu.vector_store %arg8[%c0_101, %c0_102, %c0_103], %164 {strides = array<i32>} : memref<4x8x1xf32, #tpu.memory_space<vmem>>, vector<4x8x1xf32>,
      %cst_104 = arith.constant 0.000000e+00 : f32
      %166 = vector.broadcast %cst_104 : f32 to vector<4x8x32xf32>
      %c0_105 = arith.constant 0 : index
      %c0_106 = arith.constant 0 : index
      %c0_107 = arith.constant 0 : index
      %167 = vector.load %arg9[%c0_105, %c0_106, %c0_107] : memref<4x8x32xf32, #tpu.memory_space<vmem>>, vector<4x8x32xf32>
      tpu.vector_store %arg9[%c0_105, %c0_106, %c0_107], %166 {strides = array<i32>} : memref<4x8x32xf32, #tpu.memory_space<vmem>>, vector<4x8x32xf32>,
    } else {
    }
    %c0 = arith.constant 0 : index
    %c0_1 = arith.constant 0 : index
    %c0_2 = arith.constant 0 : index
    %3 = vector.load %arg2[%c0, %c0_1, %c0_2] : memref<1x8x128xf32, #tpu.memory_space<vmem>>, vector<1x8x128xf32>
    %4 = vector.shape_cast %3 : vector<1x8x128xf32> to vector<8x128xf32>
    %cst = arith.constant 0.176776692 : f32
    %5 = vector.broadcast %cst : f32 to vector<8x128xf32>
    %6 = arith.mulf %4, %5 : vector<8x128xf32>
    %c0_3 = arith.constant 0 : index
    %c0_4 = arith.constant 0 : index
    %c0_5 = arith.constant 0 : index
    %7 = vector.load %arg3[%c0_3, %c0_4, %c0_5] : memref<1x8x128xf32, #tpu.memory_space<vmem>>, vector<1x8x128xf32>
    %8 = vector.shape_cast %7 : vector<1x8x128xf32> to vector<8x128xf32>
    %c0_6 = arith.constant 0 : index
    %c0_7 = arith.constant 0 : index
    %c0_8 = arith.constant 0 : index
    %9 = vector.load %arg4[%c0_6, %c0_7, %c0_8] : memref<1x8x128xf32, #tpu.memory_space<vmem>>, vector<1x8x128xf32>
    %10 = vector.shape_cast %9 : vector<1x8x128xf32> to vector<8x128xf32>
    %11 = vector.extract_strided_slice %6 {offsets = [0, 0], sizes = [8, 32], strides = [1, 1]} : vector<8x128xf32> to vector<8x32xf32>
    %12 = vector.extract_strided_slice %8 {offsets = [0, 0], sizes = [8, 32], strides = [1, 1]} : vector<8x128xf32> to vector<8x32xf32>
    %cst_9 = arith.constant dense<0.000000e+00> : vector<8x8xf32>
    %13 = tpu.matmul %11, %12, %cst_9 {dimension_numbers = #tpu.dot_dimension_numbers<[1], [1], [0], [0], [0, 0, 1, 0], [], []>} : vector<8x32xf32>, vector<8x32xf32>, vector<8x8xf32> -> vector<8x8xf32>
    %c0_10 = arith.constant 0 : index
    %c0_11 = arith.constant 0 : index
    %c0_12 = arith.constant 0 : index
    %14 = vector.load %arg7[%c0_10, %c0_11, %c0_12] : memref<4x8x1xf32, #tpu.memory_space<vmem>>, vector<1x8x1xf32>
    %15 = vector.shape_cast %14 : vector<1x8x1xf32> to vector<8x1xf32>
    %cst_13 = arith.constant dense<0xFF800000> : vector<8xf32>
    %16 = vector.multi_reduction <maximumf>, %13, %cst_13 [1] : vector<8x8xf32> to vector<8xf32>
    %17 = vector.shape_cast %16 : vector<8xf32> to vector<8x1xf32>
    %18 = arith.maximumf %15, %17 : vector<8x1xf32>
    %19 = arith.subf %15, %18 : vector<8x1xf32>
    %20 = math.exp %19 : vector<8x1xf32>
    %21 = vector.broadcast %18 : vector<8x1xf32> to vector<8x8xf32>
    %22 = arith.subf %13, %21 : vector<8x8xf32>
    %23 = math.exp %22 : vector<8x8xf32>
    %c0_14 = arith.constant 0 : index
    %c0_15 = arith.constant 0 : index
    %c0_16 = arith.constant 0 : index
    %24 = vector.load %arg8[%c0_14, %c0_15, %c0_16] : memref<4x8x1xf32, #tpu.memory_space<vmem>>, vector<1x8x1xf32>
    %25 = vector.shape_cast %24 : vector<1x8x1xf32> to vector<8x1xf32>
    %26 = arith.mulf %20, %25 : vector<8x1xf32>
    %cst_17 = arith.constant dense<0.000000e+00> : vector<8xf32>
    %27 = vector.multi_reduction <add>, %23, %cst_17 [1] : vector<8x8xf32> to vector<8xf32>
    %28 = vector.shape_cast %27 : vector<8xf32> to vector<8x1xf32>
    %29 = arith.addf %26, %28 : vector<8x1xf32>
    %c0_18 = arith.constant 0 : index
    %c0_19 = arith.constant 0 : index
    %c0_20 = arith.constant 0 : index
    %30 = vector.load %arg8[%c0_18, %c0_19, %c0_20] : memref<4x8x1xf32, #tpu.memory_space<vmem>>, vector<1x8x1xf32>
    %31 = vector.shape_cast %30 : vector<1x8x1xf32> to vector<8x1xf32>
    %32 = vector.shape_cast %29 : vector<8x1xf32> to vector<1x8x1xf32>
    tpu.vector_store %arg8[%c0_18, %c0_19, %c0_20], %32 {strides = array<i32>} : memref<4x8x1xf32, #tpu.memory_space<vmem>>, vector<1x8x1xf32>,
    %c0_21 = arith.constant 0 : index
    %c0_22 = arith.constant 0 : index
    %c0_23 = arith.constant 0 : index
    %33 = vector.load %arg7[%c0_21, %c0_22, %c0_23] : memref<4x8x1xf32, #tpu.memory_space<vmem>>, vector<1x8x1xf32>
    %34 = vector.shape_cast %33 : vector<1x8x1xf32> to vector<8x1xf32>
    %35 = vector.shape_cast %18 : vector<8x1xf32> to vector<1x8x1xf32>
    tpu.vector_store %arg7[%c0_21, %c0_22, %c0_23], %35 {strides = array<i32>} : memref<4x8x1xf32, #tpu.memory_space<vmem>>, vector<1x8x1xf32>,
    %36 = vector.extract_strided_slice %10 {offsets = [0, 0], sizes = [8, 32], strides = [1, 1]} : vector<8x128xf32> to vector<8x32xf32>
    %37 = arith.truncf %36 : vector<8x32xf32> to vector<8x32xbf16>
    %38 = arith.truncf %23 : vector<8x8xf32> to vector<8x8xbf16>
    %cst_24 = arith.constant dense<0.000000e+00> : vector<8x32xf32>
    %39 = tpu.matmul %38, %37, %cst_24 {dimension_numbers = #tpu.dot_dimension_numbers<[1], [0], [0], [1], [0, 0, 1, 1], [], []>} : vector<8x8xbf16>, vector<8x32xbf16>, vector<8x32xf32> -> vector<8x32xf32>
    %c0_25 = arith.constant 0 : index
    %c0_26 = arith.constant 0 : index
    %c0_27 = arith.constant 0 : index
    %40 = vector.load %arg9[%c0_25, %c0_26, %c0_27] : memref<4x8x32xf32, #tpu.memory_space<vmem>>, vector<1x8x32xf32>
    %41 = vector.shape_cast %40 : vector<1x8x32xf32> to vector<8x32xf32>
    %42 = vector.broadcast %20 : vector<8x1xf32> to vector<8x32xf32>
    %43 = arith.mulf %42, %41 : vector<8x32xf32>
    %44 = arith.addf %43, %39 : vector<8x32xf32>
    %c0_28 = arith.constant 0 : index
    %c0_29 = arith.constant 0 : index
    %c0_30 = arith.constant 0 : index
    %45 = vector.load %arg9[%c0_28, %c0_29, %c0_30] : memref<4x8x32xf32, #tpu.memory_space<vmem>>, vector<1x8x32xf32>
    %46 = vector.shape_cast %45 : vector<1x8x32xf32> to vector<8x32xf32>
    %47 = vector.shape_cast %44 : vector<8x32xf32> to vector<1x8x32xf32>
    tpu.vector_store %arg9[%c0_28, %c0_29, %c0_30], %47 {strides = array<i32>} : memref<4x8x32xf32, #tpu.memory_space<vmem>>, vector<1x8x32xf32>,
    %48 = vector.extract_strided_slice %6 {offsets = [0, 32], sizes = [8, 32], strides = [1, 1]} : vector<8x128xf32> to vector<8x32xf32>
    %49 = vector.extract_strided_slice %8 {offsets = [0, 32], sizes = [8, 32], strides = [1, 1]} : vector<8x128xf32> to vector<8x32xf32>
    %cst_31 = arith.constant dense<0.000000e+00> : vector<8x8xf32>
    %50 = tpu.matmul %48, %49, %cst_31 {dimension_numbers = #tpu.dot_dimension_numbers<[1], [1], [0], [0], [0, 0, 1, 0], [], []>} : vector<8x32xf32>, vector<8x32xf32>, vector<8x8xf32> -> vector<8x8xf32>
    %c1 = arith.constant 1 : index
    %c0_32 = arith.constant 0 : index
    %c0_33 = arith.constant 0 : index
    %51 = vector.load %arg7[%c1, %c0_32, %c0_33] : memref<4x8x1xf32, #tpu.memory_space<vmem>>, vector<1x8x1xf32>
    %52 = vector.shape_cast %51 : vector<1x8x1xf32> to vector<8x1xf32>
    %cst_34 = arith.constant dense<0xFF800000> : vector<8xf32>
    %53 = vector.multi_reduction <maximumf>, %50, %cst_34 [1] : vector<8x8xf32> to vector<8xf32>
    %54 = vector.shape_cast %53 : vector<8xf32> to vector<8x1xf32>
    %55 = arith.maximumf %52, %54 : vector<8x1xf32>
    %56 = arith.subf %52, %55 : vector<8x1xf32>
    %57 = math.exp %56 : vector<8x1xf32>
    %58 = vector.broadcast %55 : vector<8x1xf32> to vector<8x8xf32>
    %59 = arith.subf %50, %58 : vector<8x8xf32>
    %60 = math.exp %59 : vector<8x8xf32>
    %c1_35 = arith.constant 1 : index
    %c0_36 = arith.constant 0 : index
    %c0_37 = arith.constant 0 : index
    %61 = vector.load %arg8[%c1_35, %c0_36, %c0_37] : memref<4x8x1xf32, #tpu.memory_space<vmem>>, vector<1x8x1xf32>
    %62 = vector.shape_cast %61 : vector<1x8x1xf32> to vector<8x1xf32>
    %63 = arith.mulf %57, %62 : vector<8x1xf32>
    %cst_38 = arith.constant dense<0.000000e+00> : vector<8xf32>
    %64 = vector.multi_reduction <add>, %60, %cst_38 [1] : vector<8x8xf32> to vector<8xf32>
    %65 = vector.shape_cast %64 : vector<8xf32> to vector<8x1xf32>
    %66 = arith.addf %63, %65 : vector<8x1xf32>
    %c1_39 = arith.constant 1 : index
    %c0_40 = arith.constant 0 : index
    %c0_41 = arith.constant 0 : index
    %67 = vector.load %arg8[%c1_39, %c0_40, %c0_41] : memref<4x8x1xf32, #tpu.memory_space<vmem>>, vector<1x8x1xf32>
    %68 = vector.shape_cast %67 : vector<1x8x1xf32> to vector<8x1xf32>
    %69 = vector.shape_cast %66 : vector<8x1xf32> to vector<1x8x1xf32>
    tpu.vector_store %arg8[%c1_39, %c0_40, %c0_41], %69 {strides = array<i32>} : memref<4x8x1xf32, #tpu.memory_space<vmem>>, vector<1x8x1xf32>,
    %c1_42 = arith.constant 1 : index
    %c0_43 = arith.constant 0 : index
    %c0_44 = arith.constant 0 : index
    %70 = vector.load %arg7[%c1_42, %c0_43, %c0_44] : memref<4x8x1xf32, #tpu.memory_space<vmem>>, vector<1x8x1xf32>
    %71 = vector.shape_cast %70 : vector<1x8x1xf32> to vector<8x1xf32>
    %72 = vector.shape_cast %55 : vector<8x1xf32> to vector<1x8x1xf32>
    tpu.vector_store %arg7[%c1_42, %c0_43, %c0_44], %72 {strides = array<i32>} : memref<4x8x1xf32, #tpu.memory_space<vmem>>, vector<1x8x1xf32>,
    %73 = vector.extract_strided_slice %10 {offsets = [0, 32], sizes = [8, 32], strides = [1, 1]} : vector<8x128xf32> to vector<8x32xf32>
    %74 = arith.truncf %73 : vector<8x32xf32> to vector<8x32xbf16>
    %75 = arith.truncf %60 : vector<8x8xf32> to vector<8x8xbf16>
    %cst_45 = arith.constant dense<0.000000e+00> : vector<8x32xf32>
    %76 = tpu.matmul %75, %74, %cst_45 {dimension_numbers = #tpu.dot_dimension_numbers<[1], [0], [0], [1], [0, 0, 1, 1], [], []>} : vector<8x8xbf16>, vector<8x32xbf16>, vector<8x32xf32> -> vector<8x32xf32>
    %c1_46 = arith.constant 1 : index
    %c0_47 = arith.constant 0 : index
    %c0_48 = arith.constant 0 : index
    %77 = vector.load %arg9[%c1_46, %c0_47, %c0_48] : memref<4x8x32xf32, #tpu.memory_space<vmem>>, vector<1x8x32xf32>
    %78 = vector.shape_cast %77 : vector<1x8x32xf32> to vector<8x32xf32>
    %79 = vector.broadcast %57 : vector<8x1xf32> to vector<8x32xf32>
    %80 = arith.mulf %79, %78 : vector<8x32xf32>
    %81 = arith.addf %80, %76 : vector<8x32xf32>
    %c1_49 = arith.constant 1 : index
    %c0_50 = arith.constant 0 : index
    %c0_51 = arith.constant 0 : index
    %82 = vector.load %arg9[%c1_49, %c0_50, %c0_51] : memref<4x8x32xf32, #tpu.memory_space<vmem>>, vector<1x8x32xf32>
    %83 = vector.shape_cast %82 : vector<1x8x32xf32> to vector<8x32xf32>
    %84 = vector.shape_cast %81 : vector<8x32xf32> to vector<1x8x32xf32>
    tpu.vector_store %arg9[%c1_49, %c0_50, %c0_51], %84 {strides = array<i32>} : memref<4x8x32xf32, #tpu.memory_space<vmem>>, vector<1x8x32xf32>,
    %85 = vector.extract_strided_slice %6 {offsets = [0, 64], sizes = [8, 32], strides = [1, 1]} : vector<8x128xf32> to vector<8x32xf32>
    %86 = vector.extract_strided_slice %8 {offsets = [0, 64], sizes = [8, 32], strides = [1, 1]} : vector<8x128xf32> to vector<8x32xf32>
    %cst_52 = arith.constant dense<0.000000e+00> : vector<8x8xf32>
    %87 = tpu.matmul %85, %86, %cst_52 {dimension_numbers = #tpu.dot_dimension_numbers<[1], [1], [0], [0], [0, 0, 1, 0], [], []>} : vector<8x32xf32>, vector<8x32xf32>, vector<8x8xf32> -> vector<8x8xf32>
    %c2 = arith.constant 2 : index
    %c0_53 = arith.constant 0 : index
    %c0_54 = arith.constant 0 : index
    %88 = vector.load %arg7[%c2, %c0_53, %c0_54] : memref<4x8x1xf32, #tpu.memory_space<vmem>>, vector<1x8x1xf32>
    %89 = vector.shape_cast %88 : vector<1x8x1xf32> to vector<8x1xf32>
    %cst_55 = arith.constant dense<0xFF800000> : vector<8xf32>
    %90 = vector.multi_reduction <maximumf>, %87, %cst_55 [1] : vector<8x8xf32> to vector<8xf32>
    %91 = vector.shape_cast %90 : vector<8xf32> to vector<8x1xf32>
    %92 = arith.maximumf %89, %91 : vector<8x1xf32>
    %93 = arith.subf %89, %92 : vector<8x1xf32>
    %94 = math.exp %93 : vector<8x1xf32>
    %95 = vector.broadcast %92 : vector<8x1xf32> to vector<8x8xf32>
    %96 = arith.subf %87, %95 : vector<8x8xf32>
    %97 = math.exp %96 : vector<8x8xf32>
    %c2_56 = arith.constant 2 : index
    %c0_57 = arith.constant 0 : index
    %c0_58 = arith.constant 0 : index
    %98 = vector.load %arg8[%c2_56, %c0_57, %c0_58] : memref<4x8x1xf32, #tpu.memory_space<vmem>>, vector<1x8x1xf32>
    %99 = vector.shape_cast %98 : vector<1x8x1xf32> to vector<8x1xf32>
    %100 = arith.mulf %94, %99 : vector<8x1xf32>
    %cst_59 = arith.constant dense<0.000000e+00> : vector<8xf32>
    %101 = vector.multi_reduction <add>, %97, %cst_59 [1] : vector<8x8xf32> to vector<8xf32>
    %102 = vector.shape_cast %101 : vector<8xf32> to vector<8x1xf32>
    %103 = arith.addf %100, %102 : vector<8x1xf32>
    %c2_60 = arith.constant 2 : index
    %c0_61 = arith.constant 0 : index
    %c0_62 = arith.constant 0 : index
    %104 = vector.load %arg8[%c2_60, %c0_61, %c0_62] : memref<4x8x1xf32, #tpu.memory_space<vmem>>, vector<1x8x1xf32>
    %105 = vector.shape_cast %104 : vector<1x8x1xf32> to vector<8x1xf32>
    %106 = vector.shape_cast %103 : vector<8x1xf32> to vector<1x8x1xf32>
    tpu.vector_store %arg8[%c2_60, %c0_61, %c0_62], %106 {strides = array<i32>} : memref<4x8x1xf32, #tpu.memory_space<vmem>>, vector<1x8x1xf32>,
    %c2_63 = arith.constant 2 : index
    %c0_64 = arith.constant 0 : index
    %c0_65 = arith.constant 0 : index
    %107 = vector.load %arg7[%c2_63, %c0_64, %c0_65] : memref<4x8x1xf32, #tpu.memory_space<vmem>>, vector<1x8x1xf32>
    %108 = vector.shape_cast %107 : vector<1x8x1xf32> to vector<8x1xf32>
    %109 = vector.shape_cast %92 : vector<8x1xf32> to vector<1x8x1xf32>
    tpu.vector_store %arg7[%c2_63, %c0_64, %c0_65], %109 {strides = array<i32>} : memref<4x8x1xf32, #tpu.memory_space<vmem>>, vector<1x8x1xf32>,
    %110 = vector.extract_strided_slice %10 {offsets = [0, 64], sizes = [8, 32], strides = [1, 1]} : vector<8x128xf32> to vector<8x32xf32>
    %111 = arith.truncf %110 : vector<8x32xf32> to vector<8x32xbf16>
    %112 = arith.truncf %97 : vector<8x8xf32> to vector<8x8xbf16>
    %cst_66 = arith.constant dense<0.000000e+00> : vector<8x32xf32>
    %113 = tpu.matmul %112, %111, %cst_66 {dimension_numbers = #tpu.dot_dimension_numbers<[1], [0], [0], [1], [0, 0, 1, 1], [], []>} : vector<8x8xbf16>, vector<8x32xbf16>, vector<8x32xf32> -> vector<8x32xf32>
    %c2_67 = arith.constant 2 : index
    %c0_68 = arith.constant 0 : index
    %c0_69 = arith.constant 0 : index
    %114 = vector.load %arg9[%c2_67, %c0_68, %c0_69] : memref<4x8x32xf32, #tpu.memory_space<vmem>>, vector<1x8x32xf32>
    %115 = vector.shape_cast %114 : vector<1x8x32xf32> to vector<8x32xf32>
    %116 = vector.broadcast %94 : vector<8x1xf32> to vector<8x32xf32>
    %117 = arith.mulf %116, %115 : vector<8x32xf32>
    %118 = arith.addf %117, %113 : vector<8x32xf32>
    %c2_70 = arith.constant 2 : index
    %c0_71 = arith.constant 0 : index
    %c0_72 = arith.constant 0 : index
    %119 = vector.load %arg9[%c2_70, %c0_71, %c0_72] : memref<4x8x32xf32, #tpu.memory_space<vmem>>, vector<1x8x32xf32>
    %120 = vector.shape_cast %119 : vector<1x8x32xf32> to vector<8x32xf32>
    %121 = vector.shape_cast %118 : vector<8x32xf32> to vector<1x8x32xf32>
    tpu.vector_store %arg9[%c2_70, %c0_71, %c0_72], %121 {strides = array<i32>} : memref<4x8x32xf32, #tpu.memory_space<vmem>>, vector<1x8x32xf32>,
    %122 = vector.extract_strided_slice %6 {offsets = [0, 96], sizes = [8, 32], strides = [1, 1]} : vector<8x128xf32> to vector<8x32xf32>
    %123 = vector.extract_strided_slice %8 {offsets = [0, 96], sizes = [8, 32], strides = [1, 1]} : vector<8x128xf32> to vector<8x32xf32>
    %cst_73 = arith.constant dense<0.000000e+00> : vector<8x8xf32>
    %124 = tpu.matmul %122, %123, %cst_73 {dimension_numbers = #tpu.dot_dimension_numbers<[1], [1], [0], [0], [0, 0, 1, 0], [], []>} : vector<8x32xf32>, vector<8x32xf32>, vector<8x8xf32> -> vector<8x8xf32>
    %c3 = arith.constant 3 : index
    %c0_74 = arith.constant 0 : index
    %c0_75 = arith.constant 0 : index
    %125 = vector.load %arg7[%c3, %c0_74, %c0_75] : memref<4x8x1xf32, #tpu.memory_space<vmem>>, vector<1x8x1xf32>
    %126 = vector.shape_cast %125 : vector<1x8x1xf32> to vector<8x1xf32>
    %cst_76 = arith.constant dense<0xFF800000> : vector<8xf32>
    %127 = vector.multi_reduction <maximumf>, %124, %cst_76 [1] : vector<8x8xf32> to vector<8xf32>
    %128 = vector.shape_cast %127 : vector<8xf32> to vector<8x1xf32>
    %129 = arith.maximumf %126, %128 : vector<8x1xf32>
    %130 = arith.subf %126, %129 : vector<8x1xf32>
    %131 = math.exp %130 : vector<8x1xf32>
    %132 = vector.broadcast %129 : vector<8x1xf32> to vector<8x8xf32>
    %133 = arith.subf %124, %132 : vector<8x8xf32>
    %134 = math.exp %133 : vector<8x8xf32>
    %c3_77 = arith.constant 3 : index
    %c0_78 = arith.constant 0 : index
    %c0_79 = arith.constant 0 : index
    %135 = vector.load %arg8[%c3_77, %c0_78, %c0_79] : memref<4x8x1xf32, #tpu.memory_space<vmem>>, vector<1x8x1xf32>
    %136 = vector.shape_cast %135 : vector<1x8x1xf32> to vector<8x1xf32>
    %137 = arith.mulf %131, %136 : vector<8x1xf32>
    %cst_80 = arith.constant dense<0.000000e+00> : vector<8xf32>
    %138 = vector.multi_reduction <add>, %134, %cst_80 [1] : vector<8x8xf32> to vector<8xf32>
    %139 = vector.shape_cast %138 : vector<8xf32> to vector<8x1xf32>
    %140 = arith.addf %137, %139 : vector<8x1xf32>
    %c3_81 = arith.constant 3 : index
    %c0_82 = arith.constant 0 : index
    %c0_83 = arith.constant 0 : index
    %141 = vector.load %arg8[%c3_81, %c0_82, %c0_83] : memref<4x8x1xf32, #tpu.memory_space<vmem>>, vector<1x8x1xf32>
    %142 = vector.shape_cast %141 : vector<1x8x1xf32> to vector<8x1xf32>
    %143 = vector.shape_cast %140 : vector<8x1xf32> to vector<1x8x1xf32>
    tpu.vector_store %arg8[%c3_81, %c0_82, %c0_83], %143 {strides = array<i32>} : memref<4x8x1xf32, #tpu.memory_space<vmem>>, vector<1x8x1xf32>,
    %c3_84 = arith.constant 3 : index
    %c0_85 = arith.constant 0 : index
    %c0_86 = arith.constant 0 : index
    %144 = vector.load %arg7[%c3_84, %c0_85, %c0_86] : memref<4x8x1xf32, #tpu.memory_space<vmem>>, vector<1x8x1xf32>
    %145 = vector.shape_cast %144 : vector<1x8x1xf32> to vector<8x1xf32>
    %146 = vector.shape_cast %129 : vector<8x1xf32> to vector<1x8x1xf32>
    tpu.vector_store %arg7[%c3_84, %c0_85, %c0_86], %146 {strides = array<i32>} : memref<4x8x1xf32, #tpu.memory_space<vmem>>, vector<1x8x1xf32>,
    %147 = vector.extract_strided_slice %10 {offsets = [0, 96], sizes = [8, 32], strides = [1, 1]} : vector<8x128xf32> to vector<8x32xf32>
    %148 = arith.truncf %147 : vector<8x32xf32> to vector<8x32xbf16>
    %149 = arith.truncf %134 : vector<8x8xf32> to vector<8x8xbf16>
    %cst_87 = arith.constant dense<0.000000e+00> : vector<8x32xf32>
    %150 = tpu.matmul %149, %148, %cst_87 {dimension_numbers = #tpu.dot_dimension_numbers<[1], [0], [0], [1], [0, 0, 1, 1], [], []>} : vector<8x8xbf16>, vector<8x32xbf16>, vector<8x32xf32> -> vector<8x32xf32>
    %c3_88 = arith.constant 3 : index
    %c0_89 = arith.constant 0 : index
    %c0_90 = arith.constant 0 : index
    %151 = vector.load %arg9[%c3_88, %c0_89, %c0_90] : memref<4x8x32xf32, #tpu.memory_space<vmem>>, vector<1x8x32xf32>
    %152 = vector.shape_cast %151 : vector<1x8x32xf32> to vector<8x32xf32>
    %153 = vector.broadcast %131 : vector<8x1xf32> to vector<8x32xf32>
    %154 = arith.mulf %153, %152 : vector<8x32xf32>
    %155 = arith.addf %154, %150 : vector<8x32xf32>
    %c3_91 = arith.constant 3 : index
    %c0_92 = arith.constant 0 : index
    %c0_93 = arith.constant 0 : index
    %156 = vector.load %arg9[%c3_91, %c0_92, %c0_93] : memref<4x8x32xf32, #tpu.memory_space<vmem>>, vector<1x8x32xf32>
    %157 = vector.shape_cast %156 : vector<1x8x32xf32> to vector<8x32xf32>
    %158 = vector.shape_cast %155 : vector<8x32xf32> to vector<1x8x32xf32>
    tpu.vector_store %arg9[%c3_91, %c0_92, %c0_93], %158 {strides = array<i32>} : memref<4x8x32xf32, #tpu.memory_space<vmem>>, vector<1x8x32xf32>,
    %c0_i32_94 = arith.constant 0 : i32
    %159 = arith.cmpi eq, %arg1, %c0_i32_94 : i32
    %160 = arith.extui %159 : i1 to i32
    %c0_i32_95 = arith.constant 0 : i32
    %161 = arith.cmpi ne, %160, %c0_i32_95 : i32
    scf.if %161 {
      %c0_96 = arith.constant 0 : index
      %c0_97 = arith.constant 0 : index
      %c0_98 = arith.constant 0 : index
      %162 = vector.load %arg8[%c0_96, %c0_97, %c0_98] : memref<4x8x1xf32, #tpu.memory_space<vmem>>, vector<1x8x1xf32>
      %163 = vector.shape_cast %162 : vector<1x8x1xf32> to vector<8x1xf32>
      %c0_99 = arith.constant 0 : index
      %c0_100 = arith.constant 0 : index
      %c0_101 = arith.constant 0 : index
      %164 = vector.load %arg7[%c0_99, %c0_100, %c0_101] : memref<4x8x1xf32, #tpu.memory_space<vmem>>, vector<1x8x1xf32>
      %165 = vector.shape_cast %164 : vector<1x8x1xf32> to vector<8x1xf32>
      %c0_102 = arith.constant 0 : index
      %c0_103 = arith.constant 0 : index
      %c0_104 = arith.constant 0 : index
      %166 = vector.load %arg9[%c0_102, %c0_103, %c0_104] : memref<4x8x32xf32, #tpu.memory_space<vmem>>, vector<1x8x32xf32>
      %167 = vector.shape_cast %166 : vector<1x8x32xf32> to vector<8x32xf32>
      %168 = tpu.reciprocal %163 {approx = true} : vector<8x1xf32> -> vector<8x1xf32>
      %169 = vector.broadcast %168 : vector<8x1xf32> to vector<8x32xf32>
      %170 = arith.mulf %167, %169 : vector<8x32xf32>
      %171 = math.log %163 : vector<8x1xf32>
      %172 = arith.addf %171, %165 : vector<8x1xf32>
      %cst_105 = arith.constant 1.442700e+00 : f32
      %173 = vector.broadcast %cst_105 : f32 to vector<8x1xf32>
      %174 = arith.mulf %172, %173 : vector<8x1xf32>
      %c1_106 = arith.constant 1 : index
      %c0_107 = arith.constant 0 : index
      %c0_108 = arith.constant 0 : index
      %175 = vector.load %arg8[%c1_106, %c0_107, %c0_108] : memref<4x8x1xf32, #tpu.memory_space<vmem>>, vector<1x8x1xf32>
      %176 = vector.shape_cast %175 : vector<1x8x1xf32> to vector<8x1xf32>
      %c1_109 = arith.constant 1 : index
      %c0_110 = arith.constant 0 : index
      %c0_111 = arith.constant 0 : index
      %177 = vector.load %arg7[%c1_109, %c0_110, %c0_111] : memref<4x8x1xf32, #tpu.memory_space<vmem>>, vector<1x8x1xf32>
      %178 = vector.shape_cast %177 : vector<1x8x1xf32> to vector<8x1xf32>
      %c1_112 = arith.constant 1 : index
      %c0_113 = arith.constant 0 : index
      %c0_114 = arith.constant 0 : index
      %179 = vector.load %arg9[%c1_112, %c0_113, %c0_114] : memref<4x8x32xf32, #tpu.memory_space<vmem>>, vector<1x8x32xf32>
      %180 = vector.shape_cast %179 : vector<1x8x32xf32> to vector<8x32xf32>
      %181 = tpu.reciprocal %176 {approx = true} : vector<8x1xf32> -> vector<8x1xf32>
      %182 = vector.broadcast %181 : vector<8x1xf32> to vector<8x32xf32>
      %183 = arith.mulf %180, %182 : vector<8x32xf32>
      %184 = math.log %176 : vector<8x1xf32>
      %185 = arith.addf %184, %178 : vector<8x1xf32>
      %cst_115 = arith.constant 1.442700e+00 : f32
      %186 = vector.broadcast %cst_115 : f32 to vector<8x1xf32>
      %187 = arith.mulf %185, %186 : vector<8x1xf32>
      %c2_116 = arith.constant 2 : index
      %c0_117 = arith.constant 0 : index
      %c0_118 = arith.constant 0 : index
      %188 = vector.load %arg8[%c2_116, %c0_117, %c0_118] : memref<4x8x1xf32, #tpu.memory_space<vmem>>, vector<1x8x1xf32>
      %189 = vector.shape_cast %188 : vector<1x8x1xf32> to vector<8x1xf32>
      %c2_119 = arith.constant 2 : index
      %c0_120 = arith.constant 0 : index
      %c0_121 = arith.constant 0 : index
      %190 = vector.load %arg7[%c2_119, %c0_120, %c0_121] : memref<4x8x1xf32, #tpu.memory_space<vmem>>, vector<1x8x1xf32>
      %191 = vector.shape_cast %190 : vector<1x8x1xf32> to vector<8x1xf32>
      %c2_122 = arith.constant 2 : index
      %c0_123 = arith.constant 0 : index
      %c0_124 = arith.constant 0 : index
      %192 = vector.load %arg9[%c2_122, %c0_123, %c0_124] : memref<4x8x32xf32, #tpu.memory_space<vmem>>, vector<1x8x32xf32>
      %193 = vector.shape_cast %192 : vector<1x8x32xf32> to vector<8x32xf32>
      %194 = tpu.reciprocal %189 {approx = true} : vector<8x1xf32> -> vector<8x1xf32>
      %195 = vector.broadcast %194 : vector<8x1xf32> to vector<8x32xf32>
      %196 = arith.mulf %193, %195 : vector<8x32xf32>
      %197 = math.log %189 : vector<8x1xf32>
      %198 = arith.addf %197, %191 : vector<8x1xf32>
      %cst_125 = arith.constant 1.442700e+00 : f32
      %199 = vector.broadcast %cst_125 : f32 to vector<8x1xf32>
      %200 = arith.mulf %198, %199 : vector<8x1xf32>
      %c3_126 = arith.constant 3 : index
      %c0_127 = arith.constant 0 : index
      %c0_128 = arith.constant 0 : index
      %201 = vector.load %arg8[%c3_126, %c0_127, %c0_128] : memref<4x8x1xf32, #tpu.memory_space<vmem>>, vector<1x8x1xf32>
      %202 = vector.shape_cast %201 : vector<1x8x1xf32> to vector<8x1xf32>
      %c3_129 = arith.constant 3 : index
      %c0_130 = arith.constant 0 : index
      %c0_131 = arith.constant 0 : index
      %203 = vector.load %arg7[%c3_129, %c0_130, %c0_131] : memref<4x8x1xf32, #tpu.memory_space<vmem>>, vector<1x8x1xf32>
      %204 = vector.shape_cast %203 : vector<1x8x1xf32> to vector<8x1xf32>
      %c3_132 = arith.constant 3 : index
      %c0_133 = arith.constant 0 : index
      %c0_134 = arith.constant 0 : index
      %205 = vector.load %arg9[%c3_132, %c0_133, %c0_134] : memref<4x8x32xf32, #tpu.memory_space<vmem>>, vector<1x8x32xf32>
      %206 = vector.shape_cast %205 : vector<1x8x32xf32> to vector<8x32xf32>
      %207 = tpu.reciprocal %202 {approx = true} : vector<8x1xf32> -> vector<8x1xf32>
      %208 = vector.broadcast %207 : vector<8x1xf32> to vector<8x32xf32>
      %209 = arith.mulf %206, %208 : vector<8x32xf32>
      %210 = math.log %202 : vector<8x1xf32>
      %211 = arith.addf %210, %204 : vector<8x1xf32>
      %cst_135 = arith.constant 1.442700e+00 : f32
      %212 = vector.broadcast %cst_135 : f32 to vector<8x1xf32>
      %213 = arith.mulf %211, %212 : vector<8x1xf32>
      %214 = tpu.concatenate %170, %183, %196, %209 in 1 : vector<8x32xf32>, vector<8x32xf32>, vector<8x32xf32>, vector<8x32xf32> -> vector<8x128xf32>
      %c0_136 = arith.constant 0 : index
      %c0_137 = arith.constant 0 : index
      %215 = vector.load %arg5[%c0_136, %c0_137] : memref<8x128xf32, #tpu.memory_space<vmem>>, vector<8x128xf32>
      tpu.vector_store %arg5[%c0_136, %c0_137], %214 {strides = array<i32>} : memref<8x128xf32, #tpu.memory_space<vmem>>, vector<8x128xf32>,
      %216 = tpu.concatenate %174, %187, %200, %213 in 1 : vector<8x1xf32>, vector<8x1xf32>, vector<8x1xf32>, vector<8x1xf32> -> vector<8x4xf32>
      %c0_138 = arith.constant 0 : index
      %c0_139 = arith.constant 0 : index
      %c0_140 = arith.constant 0 : index
      %217 = vector.load %arg6[%c0_138, %c0_139, %c0_140] : memref<1x8x4xf32, #tpu.memory_space<vmem>>, vector<1x8x4xf32>
      %218 = vector.shape_cast %217 : vector<1x8x4xf32> to vector<8x4xf32>
      %219 = vector.shape_cast %216 : vector<8x4xf32> to vector<1x8x4xf32>
      tpu.vector_store %arg6[%c0_138, %c0_139, %c0_140], %219 {strides = array<i32>} : memref<1x8x4xf32, #tpu.memory_space<vmem>>, vector<1x8x4xf32>,
    } else {
    }
    return
  }
  func.func @transform_0(%arg0: i32, %arg1: i32) -> (i32, i32, i32) {
    %c0_i32 = arith.constant 0 : i32
    %c0_i32_0 = arith.constant 0 : i32
    %c0_i32_1 = arith.constant 0 : i32
    return %arg0, %c0_i32, %c0_i32_0 : i32, i32, i32
  }
  func.func @transform_1(%arg0: i32, %arg1: i32) -> (i32, i32, i32) {
    %c0_i32 = arith.constant 0 : i32
    %c0_i32_0 = arith.constant 0 : i32
    return %arg0, %arg1, %c0_i32 : i32, i32, i32
  }
  func.func @transform_2(%arg0: i32, %arg1: i32) -> (i32, i32, i32) {
    %c0_i32 = arith.constant 0 : i32
    %c0_i32_0 = arith.constant 0 : i32
    return %arg0, %arg1, %c0_i32 : i32, i32, i32
  }
  func.func @transform_3(%arg0: i32, %arg1: i32) -> (i32, i32) {
    %c0_i32 = arith.constant 0 : i32
    %c0_i32_0 = arith.constant 0 : i32
    return %c0_i32, %arg0 : i32, i32
  }
  func.func @transform_4(%arg0: i32, %arg1: i32) -> (i32, i32, i32) {
    %c0_i32 = arith.constant 0 : i32
    %c0_i32_0 = arith.constant 0 : i32
    %c0_i32_1 = arith.constant 0 : i32
    return %arg0, %c0_i32, %c0_i32_0 : i32, i32, i32
  }
}

</mosaic_0001>

<bundles_post_ra>
// kernel: tpu_custom_call.1
= control target key start
LH: loop header
LB: loop body
LE: loop exit
PB: predicated region body
PF: predicated region fallthrough
CT: control target
= control target key end

     0   :  { %s2086_s0 = inlined_call_operand.hbm [shape: f32[2,8,128], index: 0, kind: input, shape index: {}]   ;;  %s2087_s1 = inlined_call_operand.hbm [shape: f32[2,8,128], index: 1, kind: input, shape index: {}]   ;;  %s2088_s2 = inlined_call_operand.hbm [shape: f32[2,8,128], index: 2, kind: input, shape index: {}]   ;;  %s2089_s3 = inlined_call_operand.hbm [shape: f32[8,256], index: 3, kind: output, shape index: {0}]   ;;  %s2090_s4 = inlined_call_operand.vmem [shape: f32[2,8,4], index: 4, kind: output, shape index: {1}]  }
   0x1   :  { %2099 = sst [smem:[#allocation19_spill]] %s2087_s1 }
   0x2   :  { %10 = vsyncpa [#allocation6], 0 }
   0x3   :  { %12 = vsyncpa [#allocation6 + $0x1], 0 }
   0x4   :  { %13 = vsyncpa [#allocation9], 0 }
   0x5   :  { %15 = vsyncpa [#allocation9 + $0x1], 0 }
   0x6   :  { %16 = vsyncpa [#allocation7], 0 }
   0x7   :  { %18 = vsyncpa [#allocation7 + $0x1], 0  ;;  %s1676_s15 = smov 0   ;;  %s1678_s16 = smov 0  }
   0x8   :  { %s1680_s17 = smov 0   ;;  %s1682_s18 = smov 0  }
   0x9   :  { %s1684_s19 = smov 0   ;;  %s1686_s20 = smov 0  }
   0xa LB: > { %2100 = sst [smem:[#allocation15_spill]] %s1631_s19  ;;  %s1707_s21 = sadd.s32 4294967295, %s1635_s20   ;;  %s1635_s20 = sphi %s1686_s20, %s24_s20   ;;  %s1631_s19 = sphi %s1684_s19, %s2124_s19   ;;  %s1627_s18 = sphi %s1682_s18, %s2123_s18   ;;  %s1623_s17 = sphi %s1680_s17, %s2127_s17   ;;  %s1619_s16 = sphi %s1678_s16, %s2126_s16   ;;  %s1615_s15 = sphi %s1676_s15, %s2125_s15  }
   0xb   : > { %2101 = sst [smem:[#allocation16_spill]] %s1635_s20  ;;  %s1252_s22 = sadd.s32 4294967294, %s1635_s20  }
   0xc   : > { %s36_s23 = sadd.s32 1, %s1631_s19  ;;  %s43_s24 = sadd.s32 1, %s1623_s17 }
   0xd   : > { %p38_p0 = scmp.ge.s32.totalorder %s36_s23, 2  ;;  %p50_p1 = scmp.ne.s32.totalorder %s1623_s17, %s1619_s16 }
   0xe   : > { %p51_p2 = scmp.eq.s32.totalorder %s1635_s20, 0  ;;  %p56_p3 = scmp.ne.s32.totalorder %s1619_s16, %s1615_s15 }
   0xf   : > { %s2129_s23 = smov (%p38_p0, %s36_s23), 0  ;;  %p57_p5 = scmp.eq.s32.totalorder %s1707_s21, 0 }
  0x10   : > { %2102 = sst [smem:[#allocation17_spill]] %s2129_s23  ;;  %p1719_p4 = por %p51_p2, %p50_p1 }
  0x11   : > { %s40_s26 = ssub.s32 %s1631_s19, %s2129_s23  ;;  %p136_p6 = scmp.eq.s32.totalorder %s1707_s21, 1 }
  0x12   : > { %p41_p7 = scmp.eq.s32.totalorder %s40_s26, 0  ;;  %p1727_p8 = por %p57_p5, %p56_p3 }
  0x13   : > { %p1731_p9 = por %p136_p6, %p50_p1  ;;  %p142_p10 = scmp.eq.s32.totalorder %s1252_s22, 1 }
  0x14   : > { %s2104_s27 = scalar_select %p1727_p8, 1, 0 }
  0x15   : > { %s2105_s28 = scalar_select %p1731_p9, 1, 0 }
  0x16   : > { %s1736_s29 = scalar_select %p41_p7, %s1623_s17, %s43_s24  }
  0x17   : > { %p1738_p11 = por %p142_p10, %p56_p3  ;;  %p1365_p13 = scmp.lt.s32.totalorder %s1635_s20, 2 }
  0x18   : > { %2106 = sst [smem:[#allocation18_spill]] %s1736_s29  ;;  %s2091_s5 = sand.u32 1, %s1623_s17  }
  0x19   : > { %s2107_s30 = scalar_select %p1738_p11, 1, 0 }
  0x1a   : > { %s1747_s6 = sshll.u32 %s2091_s5, 3  ;;  %s1750_s7 = sshll.u32 %s1631_s19, 7 }
  0x1b   : > { %p1754_p0 = pnand %p1365_p13, %p1719_p4  ;;  %s206_s9 = sand.u32 1, %s1635_s20  }
  0x1c   : > { %s2109_s1 = sld [smem:[#allocation19_spill]]  ;;  %s210_s13 = scalar_lea.vmem [#allocation8], %s1747_s6 }
  0x1d   : > { %s2108_s8 = scalar_select %p1754_p0, 1, 0 }
  0x1e   : > { %s218_s14 = sshll.u32 %s210_s13, 4  ;;  %s1770_s22 = scalar_lea.sflag [#allocation9], %s206_s9  ;;  %s1767_s14 = int_to_ptr.vmem [resolvable:$true] %s218_s14 }
  0x1f   : > { %p1776_p4 = pneg %p1754_p0 }
  0x22   : > { %s1763_s12 = scalar_lea.hbm %s2109_s1, %s1750_s7  ;;  %s1464_s11 = scalar_lea.hbm %s2109_s1, 256 }
  0x23   : > { %s1459_s24 = scalar_lea.hbm %s1763_s12, 128  ;;  %p1465_p7 = scmp.lt.u32.totalorder %s1763_s12, %s2109_s1 }
  0x24   : > { %p1460_p3 = scmp.ne.s32.totalorder %s1763_s12, %s1459_s24  ;;  %p1466_p10 = scmp.lt.u32.totalorder %s1464_s11, %s1459_s24 }
  0x25   : > { %p1468_p12 = scmp.lt.u32.totalorder %s1459_s24, %s1763_s12 }
  0x26   : > { %p1462_p5 = pnand %p1776_p4, %p1460_p3  ;;  %p1467_p13 = por %p1466_p10, %p1465_p7 }
  0x28   : > { %p1463_p6 = pneg %p1462_p5  ;;  %p1469_p1 = por %p1468_p12, %p1467_p13 }
  0x2a   : > { %p1470_p2 = pnand %p1469_p1, %p1463_p6 }
  0x2c   : > { %1473 = shalt.err (!%p1470_p2)
}
  0x2d   : > { %s1474_s9 = scalar_lea.vmem %s1767_s14, 128  ;;  %s1637_s26 = smov [#allocation8]  }
  0x2e   : > { %p1475_p3 = scmp.ne.s32.totalorder %s1767_s14, %s1474_s9  ;;  %s1479_s10 = sshll.u32 %s1637_s26, 4  ;;  %s1480_s10 = int_to_ptr.vmem [resolvable:$false] %s1479_s10 }
  0x2f   : > { %s1481_s5 = scalar_lea.vmem %s1480_s10, 256  ;;  %p1482_p9 = scmp.lt.s32.totalorder %s1767_s14, %s1480_s10 }
  0x30   : > { %p1477_p5 = pnand %p1475_p3, %p1776_p4  ;;  %p1483_p8 = scmp.lt.s32.totalorder %s1481_s5, %s1474_s9 }
  0x32   : > { %p1478_p11 = pneg %p1477_p5  ;;  %p1484_p7 = por %p1483_p8, %p1482_p9 }
  0x34   : > { %p1485_p10 = pnand %p1484_p7, %p1478_p11 }
  0x36   : > { %1488 = shalt.err (!%p1485_p10)
}
  0x37   : > { %1357 = dma.hbm_to_vmem [thread:$0]  (!%p1754_p0), %s1763_s12, 128, %s1767_s14, %s1770_s22  }
  0x38   : > { %p2111_p12 = scmp.lt.s32.totalorder %s1635_s20, 3  ;;  %p2112_p1 = scmp.ge.s32.totalorder %s1635_s20, 1 }
  0x39   : > { %s1812_s9 = scalar_lea.hbm %s2086_s0, %s1750_s7  ;;  %s192_s26 = scalar_lea.vmem [#allocation5], %s1747_s6 }
  0x3a   : > { %p1804_p2 = pnand %p2112_p1, %p2111_p12  ;;  %s199_s10 = sshll.u32 %s192_s26, 4  ;;  %s1815_s10 = int_to_ptr.vmem [resolvable:$true] %s199_s10 }
  0x3b   : > { %s1821_s5 = scalar_lea.hbm %s2088_s2, %s1750_s7  ;;  %s2114_s1 = sand.u32 1, %s1623_s17  }
  0x3c   : > { %s2113_s24 = scalar_select %p1804_p2, 1, 0 }
  0x3d   : > { %s189_s23 = scalar_lea.sflag [#allocation6], %s2114_s1  ;;  %s1489_s19 = scalar_lea.hbm %s1812_s9, 128 }
  0x3e   : > { %p1490_p8 = scmp.ne.s32.totalorder %s1812_s9, %s1489_s19  ;;  %s1494_s29 = scalar_lea.hbm %s2086_s0, 256 }
  0x3f   : > { %p1495_p6 = scmp.lt.u32.totalorder %s1812_s9, %s2086_s0  ;;  %p1496_p13 = scmp.lt.u32.totalorder %s1494_s29, %s1489_s19 }
  0x40   : > { %p1492_p9 = pnand %p1490_p8, %p1776_p4  ;;  %p1498_p5 = scmp.lt.u32.totalorder %s1489_s19, %s1812_s9 }
  0x41   : > { %p1497_p3 = por %p1496_p13, %p1495_p6 }
  0x42   : > { %p1493_p11 = pneg %p1492_p9 }
  0x43   : > { %p1499_p7 = por %p1498_p5, %p1497_p3 }
  0x45   : > { %p1500_p10 = pnand %p1499_p7, %p1493_p11 }
  0x47   : > { %1503 = shalt.err (!%p1500_p10)
}
  0x48   : > { %s1504_s1 = scalar_lea.vmem %s1815_s10, 128  ;;  %s1638_s7 = smov [#allocation5]  }
  0x49   : > { %p1505_p12 = scmp.ne.s32.totalorder %s1815_s10, %s1504_s1  ;;  %s1509_s12 = sshll.u32 %s1638_s7, 4  ;;  %s1510_s12 = int_to_ptr.vmem [resolvable:$false] %s1509_s12 }
  0x4a   : > { %s1511_s20 = scalar_lea.vmem %s1510_s12, 256  ;;  %p1512_p9 = scmp.lt.s32.totalorder %s1815_s10, %s1510_s12 }
  0x4b   : > { %p1507_p1 = pnand %p1505_p12, %p1776_p4  ;;  %p1513_p2 = scmp.lt.s32.totalorder %s1511_s20, %s1504_s1 }
  0x4d   : > { %p1508_p8 = pneg %p1507_p1  ;;  %p1514_p6 = por %p1513_p2, %p1512_p9 }
  0x4f   : > { %p1515_p13 = pnand %p1514_p6, %p1508_p8 }
  0x51   : > { %1518 = shalt.err (!%p1515_p13)
}
  0x52   : > { %1354 = dma.hbm_to_vmem [thread:$0]  (!%p1754_p0), %s1812_s9, 128, %s1815_s10, %s189_s23  }
  0x53   : > { %s229_s19 = scalar_lea.vmem [#allocation10], %s1747_s6  ;;  %s1519_s14 = scalar_lea.hbm %s1821_s5, 128 }
  0x54   : > { %s237_s29 = sshll.u32 %s229_s19, 4  ;;  %p1520_p11 = scmp.ne.s32.totalorder %s1821_s5, %s1519_s14  ;;  %s238_s29 = int_to_ptr.vmem [resolvable:$true] %s237_s29 }
  0x55   : > { %s1524_s26 = scalar_lea.hbm %s2088_s2, 256  ;;  %p1525_p5 = scmp.lt.u32.totalorder %s1821_s5, %s2088_s2 }
  0x56   : > { %p1522_p2 = pnand %p1520_p11, %p1776_p4  ;;  %p1526_p7 = scmp.lt.u32.totalorder %s1524_s26, %s1519_s14 }
  0x57   : > { %p1528_p12 = scmp.lt.u32.totalorder %s1519_s14, %s1821_s5 }
  0x58   : > { %p1523_p3 = pneg %p1522_p2  ;;  %p1527_p10 = por %p1526_p7, %p1525_p5 }
  0x5a   : > { %p1529_p1 = por %p1528_p12, %p1527_p10 }
  0x5c   : > { %p1530_p8 = pnand %p1529_p1, %p1523_p3 }
  0x5e   : > { %1533 = shalt.err (!%p1530_p8)
}
  0x5f   : > { %s1534_s23 = scalar_lea.vmem %s238_s29, 128  ;;  %s1639_s6 = smov [#allocation10]  }
  0x60   : > { %p1535_p9 = scmp.ne.s32.totalorder %s238_s29, %s1534_s23  ;;  %s1539_s9 = sshll.u32 %s1639_s6, 4  ;;  %s1540_s9 = int_to_ptr.vmem [resolvable:$false] %s1539_s9 }
  0x61   : > { %s1541_s10 = scalar_lea.vmem %s1540_s9, 256  ;;  %p1542_p11 = scmp.lt.s32.totalorder %s238_s29, %s1540_s9 }
  0x62   : > { %p1537_p6 = pnand %p1535_p9, %p1776_p4  ;;  %p1543_p2 = scmp.lt.s32.totalorder %s1541_s10, %s1534_s23 }
  0x64   : > { %p1538_p13 = pneg %p1537_p6  ;;  %p1544_p0 = por %p1543_p2, %p1542_p11 }
  0x66   : > { %p1545_p5 = pnand %p1544_p0, %p1538_p13 }
  0x68   : > { %1548 = shalt.err (!%p1545_p5)
}
  0x69   : > { %p2115_p7 = scmp.ne.s32.totalorder %s2108_s8, 0  ;;  %p2116_p3 = scmp.ne.s32.totalorder %s2113_s24, 0 }
  0x6a   : > { %s1868_s25 = sand.u32 (!%p2116_p3), 1, %s1619_s16   ;;  %p2117_p0 = scmp.ne.s32.totalorder (!%p2116_p3), %s2104_s27, 0 }
  0x6b   : > { %1360 = dma.hbm_to_vmem [thread:$0]  (!%p2115_p7), %s1821_s5, 128, %s238_s29, %s1770_s22  }
  0x6c   : > { %246 = sbr.rel (%p2116_p3) target bundleno = 1678 (0x68e), region = 32  ;;  %s1871_s12 = sshll.u32 (!%p2116_p3), %s1868_s25, 3 }
  0x6d   : > { %s249_s20 = scalar_lea.sflag (!%p2116_p3), [#allocation6], %s1868_s25  ;;  %s252_s19 = scalar_lea.vmem (!%p2116_p3), [#allocation5], %s1871_s12 }
  0x73   : > { %1602 = dma.done.wait (%p2117_p0), %s249_s20, 128  }
  0x74   : > { %1604 = vsyncadd (%p2117_p0), %s249_s20, 4294967168  ;;  %s257_s8 = sand.u32 1, %s1707_s21   ;;  %s261_s24 = scalar_lea.vmem [#allocation8], %s1871_s12 }
  0x75   : > { %s258_s22 = scalar_lea.sflag [#allocation9], %s257_s8 }
  0x76   : > { %1606 = dma.done.wait (%p2117_p0), %s258_s22, 256  }
  0x77   : > { %1608 = vsyncadd (%p2117_p0), %s258_s22, 4294967040  ;;  %vm327_vm0 = vcmask 261120   ;;  %v1640_v0 = vmov 0.0   ;;  %vm1641_vm1 = vmmov 0   ;;  %v334_v1 = vld [vmem:[%s261_s24] sm:$0xff]  ;;  %v332_v2 = vld [vmem:[%s252_s19] sm:$0xff] }
  0x78   : > { %1299 = vmatprep.subr.mxu1 %v1640_v0  ;;  %328 = vst.msk [vmem:[#allocation4] sm:$0xff] %vm327_vm0, %v1640_v0  ;;  %329 = vst.msk [vmem:[#allocation4 + $0x8] sm:$0xff] %vm327_vm0, %v1640_v0  ;;  %1301 = vmatprep.mubr.msk.f32.mxu1 %vm1641_vm1, %v1640_v0  ;;  %s1642_s21 = smov 96   ;;  %v333_v3 = vmul.f32 0.17677669, %v332_v2  ;;  %vm318_vm2 = vcmask 7168  }
  0x79   : > { %330 = vst.msk [vmem:[#allocation4 + $0x10] sm:$0xff] %vm327_vm0, %v1640_v0  ;;  %331 = vst.msk [vmem:[#allocation4 + $0x18] sm:$0xff] %vm327_vm0, %v1640_v0  ;;  %1310 = vmatprep.subr.mxu0 %v1640_v0  ;;  %1312 = vmatprep.mubr.msk.f32.mxu0 %vm1641_vm1, %v1640_v0  ;;  %v1643_v6 = vmov -inf   ;;  %vm414_vm3 = vcmask 64512   ;;  %v1644_v10 = vmov 0   ;;  %s270_s27 = scalar_lea.vmem [#allocation10], %s1871_s12 }
  0x7a   : > { %499 = vrot.lane.b32.xlu0 %v334_v1, %s1642_s21  ;;  %1300 = vmatpush3.xpose.msk.msra.mxu1 %vm327_vm0, %v334_v1  ;;  %319 = vst.msk [vmem:[#allocation2] sm:$0xff] %vm318_vm2, %v1643_v6  ;;  %320 = vst.msk [vmem:[#allocation2 + $0x8] sm:$0xff] %vm318_vm2, %v1643_v6  ;;  %v335_v16 = vld [vmem:[%s270_s27] sm:$0xff]  ;;  %vm444_vm4 = vcmask 1043456   ;;  %s1645_s5 = smov 64   ;;  %s1646_s29 = smov 32  }
  0x7b   : > { %1304 = vmatprep.subr.bf16.mxu1 %v1640_v0  ;;  %321 = vst.msk [vmem:[#allocation2 + $0x10] sm:$0xff] %vm318_vm2, %v1643_v6  ;;  %322 = vst.msk [vmem:[#allocation2 + $0x18] sm:$0xff] %vm318_vm2, %v1643_v6  ;;  %1425 = vset.pattern.permute.xlu0 %v1644_v10  ;;  %v1936_v19 = vpack.c.bf16 %v335_v16, %v335_v16  ;;  %s1647_s14 = smov 1   ;;  %s1648_s11 = smov 3   ;;  %vm1059_vm5 = vcmask 523264   ;;  %vm1061_vm6 = vcmask 785408  }
  0x7c   : > { %323 = vst.msk [vmem:[#allocation3] sm:$0xff] %vm318_vm2, %v1640_v0  ;;  %324 = vst.msk [vmem:[#allocation3 + $0x8] sm:$0xff] %vm318_vm2, %v1640_v0  ;;  %1426 = vset.pattern.permute.xlu1 %v1644_v10  ;;  %s1649_s13 = smov 2   ;;  %p309_p4 = scmp.lt.s32.totalorder %s1627_s18, 1  ;;  %vm1077_vm7 = vcmask 15360   ;;  %vm1079_vm8 = vcmask 23552  }
  0x7d   : > { %1302 = vmatmul.mubr.msk.f32.vlgmr.msra.gmra.mrb[0].mxu1 %vm327_vm0, %v333_v3  ;;  %325 = vst.msk [vmem:[#allocation3 + $0x10] sm:$0xff] %vm318_vm2, %v1640_v0  ;;  %326 = vst.msk [vmem:[#allocation3 + $0x18] sm:$0xff] %vm318_vm2, %v1640_v0  ;;  %v446_v20 = vsel %vm444_vm4, %v1936_v19, 0  ;;  %s1280_s1 = sshll.u32 %s1627_s18, 7  ;;  %s302_s7 = scalar_lea.vmem [#allocation11], %s1871_s12 }
  0x7e   : > { %497 = vrot.lane.b32.xlu0 %v333_v3, %s1642_s21  ;;  %1306 = vmatprep.mubr.msk.bf16.mxu1 %vm1641_vm1, %v1640_v0  ;;  %s2020_s26 = scalar_select %p309_p4, %s1627_s18, 1 }
  0x7f   : > { %1305 = vmatpush3.bf16.msra.mxu1 %v446_v20  ;;  %s1101_s23 = sshll.u32 %s302_s7, 4  ;;  %s2028_s10 = scalar_lea.hbm %s2089_s3, %s1280_s1  ;;  %s2030_s23 = int_to_ptr.vmem [resolvable:$true] %s1101_s23 }
  0x80   : > { %1321 = vmatprep.subr.mxu1 %v1640_v0  ;;  %s1266_s18 = sshll.u32 %s2020_s26, 3  ;;  %s1084_s12 = scalar_lea.sflag [#allocation7], %s1868_s25 }
  0x81   : > { %v1925_v14 = vld [vmem:[#allocation2] sm:$0xff]  ;;  %v1946_v21 = vld [vmem:[#allocation2 + $0x8] sm:$0xff]  ;;  %s1549_s20 = scalar_lea.vmem %s2030_s23, 128  ;;  %p2118_p12 = scmp.ne.s32.totalorder %s2105_s28, 0 }
  0x82   : > { %v740_v55 = vld [vmem:[#allocation2 + $0x10] sm:$0xff]  ;;  %v903_v59 = vld [vmem:[#allocation2 + $0x18] sm:$0xff]  ;;  %p1550_p10 = scmp.ne.s32.totalorder %s2030_s23, %s1549_s20  ;;  %s1650_s19 = smov [#allocation11]  }
  0x83   : > { %s1553_s8 = sshll.u32 %s1650_s19, 4  ;;  %s1554_s8 = int_to_ptr.vmem [resolvable:$false] %s1553_s8 }
  0x84   : > { %p1551_p1 = pnand %p1550_p10, %p2118_p12  ;;  %s1555_s22 = scalar_lea.vmem %s1554_s8, 256 }
  0x85   : > { %p1556_p9 = scmp.lt.s32.totalorder %s2030_s23, %s1554_s8  ;;  %p1557_p6 = scmp.lt.s32.totalorder %s1555_s22, %s1549_s20 }
  0x86   : > { %p1552_p8 = pneg %p1551_p1 }
  0x87   : > { %p1558_p13 = por %p1557_p6, %p1556_p9 }
  0x89   : > { %p1559_p11 = pnand %p1558_p13, %p1552_p8 }
  0xec   : > { %v500_v4 = vpop.permute.xlu0 %499 }
  0xed   : > { %1311 = vmatpush3.xpose.msk.msra.mxu0 %vm327_vm0, %v500_v4 }
  0xee   : > { %1315 = vmatprep.subr.bf16.mxu0 %v1640_v0 }
  0xf0   : > { %v498_v5 = vpop.permute.xlu0 %497 }
  0xf1   : > { %1313 = vmatmul.mubr.msk.f32.vlgmr.msra.gmra.mrb[0].mxu0 %vm327_vm0, %v498_v5 }
  0xf2   : > { %1317 = vmatprep.mubr.msk.bf16.mxu0 %vm1641_vm1, %v1640_v0 }
 0x150   : > { %v409_v7 = vpop.f32.mrb[0].mxu1 }
 0x151   : > { %v415_v8 = vsel %vm414_vm3, %v409_v7, -inf  ;;  %v1303_v9 = vpop.f32.mrb[1].mxu1 }
 0x152   : > { %416 = vmax.xlane.f32.xlu1 %v415_v8 }
 0x1c4   : > { %v571_v11 = vpop.f32.mrb[0].mxu0 }
 0x1c5   : > { %v1314_v12 = vpop.f32.mrb[1].mxu0  ;;  %v577_v13 = vsel %vm414_vm3, %v571_v11, -inf }
 0x1c6   : > { %578 = vmax.xlane.f32.xlu1 %v577_v13 }
 0x1df   : > { %v417_v15 = vpop.xlane.xlu1 %416 }
 0x1e0   : > { %v1929_v17 = vmax.f32 %v1925_v14, %v417_v15 }
 0x1e2   : > { %v419_v18 = vsub.f32 %v1925_v14, %v1929_v17  ;;  %438 = vst.msk [vmem:[#allocation2] sm:$0xff] %vm318_vm2, %v1929_v17  ;;  %424 = vperm.xlu0 %1425, %v1929_v17  }
 0x1e6   : > { %603 = vrot.lane.b32.xlu0 %v1936_v19, %s1642_s21 }
 0x1ea   : > { %663 = vrot.lane.b32.xlu0 %v334_v1, %s1645_s5 }
 0x1ee   : > { %826 = vrot.lane.b32.xlu0 %v334_v1, %s1646_s29 }
 0x1f2   : > { %824 = vrot.lane.b32.xlu0 %v333_v3, %s1646_s29 }
 0x253   : > { %v579_v22 = vpop.xlane.xlu1 %578 }
 0x254   : > { %v1949_v23 = vmax.f32 %v1946_v21, %v579_v22 }
 0x256   : > { %v581_v24 = vsub.f32 %v1946_v21, %v1949_v23  ;;  %600 = vst.msk [vmem:[#allocation2 + $0x8] sm:$0xff] %vm318_vm2, %v1949_v23  ;;  %586 = vperm.xlu1 %1426, %v1949_v23  }
 0x258   : > { %v582_v1 = vmul.f32 1.442695, %v581_v24  ;;  %v420_v24 = vmul.f32 1.442695, %v419_v18 }
 0x25a   : > { %661 = vrot.lane.b32.xlu1 %v333_v3, %s1645_s5 }
 0x261   : > { %v425_v25 = vpop.permute.xlu0 %424 }
 0x262   : > { %v427_v26 = vsub.f32 %v409_v7, %v425_v25 }
 0x264   : > { %v428_v27 = vmul.f32 1.442695, %v427_v26 }
 0x265   : > { %v604_v28 = vpop.permute.xlu0 %603 }
 0x266   : > { %1427 = vpow2.f32 %v428_v27  ;;  %v609_v29 = vsel %vm444_vm4, %v604_v28, 0  ;;  %v593_v28 = vld [vmem:[#allocation3 + $0x8] sm:$0xff] }
 0x267   : > { %1316 = vmatpush3.bf16.msra.mxu0 %v609_v29 }
 0x268   : > { %1332 = vmatprep.subr.mxu0 %v1640_v0 }
 0x269   : > { %v664_v32 = vpop.permute.xlu0 %663 }
 0x26d   : > { %v827_v38 = vpop.permute.xlu0 %826 }
 0x270   : > { %v1428_v30 = vpop.eup %1427 }
 0x271   : > { %v440_v31 = vpack.c.bf16 %v1428_v30, %v1428_v30  ;;  %v825_v40 = vpop.permute.xlu0 %824 }
 0x273   : > { %1307 = vmatmul.mubr.msk.bf16.vlgmr.msra.gmra.mrb[4].mxu1 %vm414_vm3, %v440_v31  ;;  %v430_v31 = vld [vmem:[#allocation3] sm:$0xff] }
 0x274   : > { %1322 = vmatpush3.xpose.msk.msra.mxu1 %vm327_vm0, %v664_v32  ;;  %1323 = vmatprep.mubr.msk.f32.mxu1 %vm1641_vm1, %v1640_v0 }
 0x275   : > { %1326 = vmatprep.subr.bf16.mxu1 %v1640_v0 }
 0x2d5   : > { %v587_v33 = vpop.permute.xlu1 %586 }
 0x2d6   : > { %v589_v34 = vsub.f32 %v571_v11, %v587_v33 }
 0x2d8   : > { %v590_v35 = vmul.f32 1.442695, %v589_v34 }
 0x2d9   : > { %v662_v36 = vpop.permute.xlu1 %661 }
 0x2da   : > { %1429 = vpow2.f32 %v590_v35  ;;  %1324 = vmatmul.mubr.msk.f32.vlgmr.msra.gmra.mrb[2].mxu1 %vm327_vm0, %v662_v36  ;;  %v652_v36 = vld [vmem:[#allocation4 + $0x8] sm:$0xff] }
 0x2db   : > { %1328 = vmatprep.mubr.msk.bf16.mxu1 %vm1641_vm1, %v1640_v0  ;;  %1431 = vpow2.f32 %v582_v1 }
 0x2e4   : > { %v1430_v37 = vpop.eup %1429 }
 0x2e5   : > { %v601_v39 = vpack.c.bf16 %v1430_v37, %v1430_v37  ;;  %v595_v63 = vsel %vm414_vm3, %v1430_v37, 0.0  ;;  %v1432_v3 = vpop.eup %1431 }
 0x2e6   : > { %v594_v29 = vmul.f32 %v1432_v3, %v593_v28 }
 0x2e7   : > { %1318 = vmatmul.mubr.msk.bf16.vlgmr.msra.gmra.mrb[4].mxu0 %vm414_vm3, %v601_v39 }
 0x2e8   : > { %1333 = vmatpush3.xpose.msk.msra.mxu0 %vm327_vm0, %v827_v38  ;;  %1334 = vmatprep.mubr.msk.f32.mxu0 %vm1641_vm1, %v1640_v0 }
 0x2e9   : > { %1337 = vmatprep.subr.bf16.mxu0 %v1640_v0 }
 0x2ef   : > { %1335 = vmatmul.mubr.msk.f32.vlgmr.msra.gmra.mrb[2].mxu0 %vm327_vm0, %v825_v40 }
 0x2f0   : > { %1339 = vmatprep.mubr.msk.bf16.mxu0 %vm1641_vm1, %v1640_v0  ;;  %v432_v0 = vsel %vm414_vm3, %v1428_v30, 0.0 }
 0x346   : > { %v1975_v41 = vpop.f32.mrb[4].mxu1 }
 0x347   : > { %v1308_v42 = vpop.f32.mrb[5].mxu1 }
 0x348   : > { %v485_v43 = vpop.f32.mrb[6].mxu1  ;;  %v757_v42 = vld [vmem:[#allocation3 + $0x10] sm:$0xff] }
 0x349   : > { %v1309_v44 = vpop.f32.mrb[7].mxu1 }
 0x3ad   : > { %v735_v45 = vpop.f32.mrb[2].mxu1 }
 0x3ae   : > { %v741_v46 = vsel %vm414_vm3, %v735_v45, -inf  ;;  %v1325_v47 = vpop.f32.mrb[3].mxu1 }
 0x3af   : > { %742 = vmax.xlane.f32.xlu1 %v741_v46  ;;  %v920_v47 = vld [vmem:[#allocation3 + $0x18] sm:$0xff] }
 0x3ba   : > { %v1978_v48 = vpop.f32.mrb[4].mxu0 }
 0x3bb   : > { %v1319_v49 = vpop.f32.mrb[5].mxu0 }
 0x3bc   : > { %v648_v50 = vpop.f32.mrb[6].mxu0 }
 0x3bd   : > { %v1320_v51 = vpop.f32.mrb[7].mxu0 }
 0x3c2   : > { %v898_v52 = vpop.f32.mrb[2].mxu0 }
 0x3c3   : > { %v1336_v53 = vpop.f32.mrb[3].mxu0  ;;  %v904_v54 = vsel %vm414_vm3, %v898_v52, -inf }
 0x3c4   : > { %905 = vmax.xlane.f32.xlu0 %v904_v54 }
 0x43c   : > { %v743_v56 = vpop.xlane.xlu1 %742 }
 0x43d   : > { %v744_v57 = vmax.f32 %v740_v55, %v743_v56 }
 0x43f   : > { %v745_v58 = vsub.f32 %v740_v55, %v744_v57  ;;  %764 = vst.msk [vmem:[#allocation2 + $0x10] sm:$0xff] %vm318_vm2, %v744_v57  ;;  %750 = vperm.xlu0 %1425, %v744_v57  }
 0x441   : > { %v746_v2 = vmul.f32 1.442695, %v745_v58 }
 0x443   : > { %929 = vrot.lane.b32.xlu0 %v1936_v19, %s1646_s29  ;;  %1433 = vpow2.f32 %v746_v2 }
 0x44d   : > { %v1434_v4 = vpop.eup %1433 }
 0x44e   : > { %v758_v43 = vmul.f32 %v1434_v4, %v757_v42  ;;  %v991_v42 = vld [vmem:[#allocation2] sm:$0xff] }
 0x451   : > { %v906_v60 = vpop.xlane.xlu0 %905 }
 0x452   : > { %v907_v61 = vmax.f32 %v903_v59, %v906_v60 }
 0x454   : > { %v908_v62 = vsub.f32 %v903_v59, %v907_v61  ;;  %927 = vst.msk [vmem:[#allocation2 + $0x18] sm:$0xff] %vm318_vm2, %v907_v61  ;;  %913 = vperm.xlu1 %1426, %v907_v61   ;;  %v1005_v59 = vld [vmem:[#allocation2 + $0x8] sm:$0xff] }
 0x456   : > { %v909_v25 = vmul.f32 1.442695, %v908_v62 }
 0x458   : > { %766 = vrot.lane.b32.xlu1 %v1936_v19, %s1645_s5 }
 0x47c   : > { %596 = vadd.xlane.f32.xlu1 %v595_v63 }
 0x480   : > { %433 = vadd.xlane.f32.xlu1 %v432_v0 }
 0x491   : > { %655 = vperm.xlu1 %1426, %v1432_v3   ;;  %v815_v3 = vld [vmem:[#allocation4 + $0x10] sm:$0xff] }
 0x495   : > { %818 = vperm.xlu1 %1426, %v1434_v4  }
 0x4be   : > { %v751_v5 = vpop.permute.xlu0 %750 }
 0x4bf   : > { %v753_v6 = vsub.f32 %v735_v45, %v751_v5 }
 0x4c1   : > { %v754_v7 = vmul.f32 1.442695, %v753_v6 }
 0x4c2   : > { %v930_v8 = vpop.permute.xlu0 %929 }
 0x4c3   : > { %1435 = vpow2.f32 %v754_v7  ;;  %v935_v9 = vsel %vm444_vm4, %v930_v8, 0 }
 0x4c4   : > { %1338 = vmatpush3.bf16.msra.mxu0 %v935_v9 }
 0x4cd   : > { %v1436_v10 = vpop.eup %1435 }
 0x4ce   : > { %v759_v11 = vsel %vm414_vm3, %v1436_v10, 0.0  ;;  %v765_v20 = vpack.c.bf16 %v1436_v10, %v1436_v10  ;;  %v978_v10 = vld [vmem:[#allocation4 + $0x18] sm:$0xff] }
 0x4cf   : > { %760 = vadd.xlane.f32.xlu0 %v759_v11 }
 0x4d3   : > { %v914_v12 = vpop.permute.xlu1 %913 }
 0x4d4   : > { %v916_v13 = vsub.f32 %v898_v52, %v914_v12  ;;  %v488_v52 = vld [vmem:[#allocation4] sm:$0xff] }
 0x4d6   : > { %v917_v15 = vmul.f32 1.442695, %v916_v13 }
 0x4d7   : > { %v767_v16 = vpop.permute.xlu1 %766 }
 0x4d8   : > { %1437 = vpow2.f32 %v917_v15  ;;  %v772_v19 = vsel %vm444_vm4, %v767_v16, 0 }
 0x4d9   : > { %1327 = vmatpush3.bf16.msra.mxu1 %v772_v19  ;;  %1439 = vpow2.f32 %v420_v24 }
 0x4da   : > { %1441 = vpow2.f32 %v909_v25  ;;  %v1033_v25 = vld [vmem:[#allocation2 + $0x18] sm:$0xff] }
 0x4dc   : > { %1329 = vmatmul.mubr.msk.bf16.vlgmr.msra.gmra.mrb[8].mxu1 %vm414_vm3, %v765_v20 }
 0x4e2   : > { %v1438_v21 = vpop.eup %1437 }
 0x4e3   : > { %v922_v22 = vsel %vm414_vm3, %v1438_v21, 0.0  ;;  %v928_v23 = vpack.c.bf16 %v1438_v21, %v1438_v21  ;;  %v1440_v26 = vpop.eup %1439 }
 0x4e4   : > { %923 = vadd.xlane.f32.xlu0 %v922_v22  ;;  %v1442_v27 = vpop.eup %1441  ;;  %v431_v33 = vmul.f32 %v1440_v26, %v430_v31 }
 0x4e5   : > { %1340 = vmatmul.mubr.msk.bf16.vlgmr.msra.gmra.mrb[8].mxu0 %vm414_vm3, %v928_v23 }
 0x4fa   : > { %491 = vperm.xlu0 %1425, %v1440_v26  }
 0x4fe   : > { %981 = vperm.xlu0 %1425, %v1442_v27  }
 0x509   : > { %v597_v30 = vpop.xlane.xlu1 %596 }
 0x50a   : > { %v598_v32 = vadd.f32 %v597_v30, %v594_v29 }
 0x50c   : > { %599 = vst.msk [vmem:[#allocation3 + $0x8] sm:$0xff] %vm318_vm2, %v598_v32 }
 0x50d   : > { %v434_v34 = vpop.xlane.xlu1 %433 }
 0x50e   : > { %v435_v35 = vadd.f32 %v434_v34, %v431_v33  ;;  %v1019_v33 = vld [vmem:[#allocation2 + $0x10] sm:$0xff] }
 0x510   : > { %437 = vst.msk [vmem:[#allocation3] sm:$0xff] %vm318_vm2, %v435_v35 }
 0x511   : > { %v656_v14 = vpop.permute.xlu1 %655 }
 0x512   : > { %v658_v17 = vmul.f32 %v656_v14, %v652_v36 }
 0x513   : > { %v1004_v18 = vld [vmem:[#allocation3 + $0x8] sm:$0xff] }
 0x514   : > { %v659_v37 = vadd.f32 %v658_v17, %v1978_v48  ;;  %1443 = vrcp.f32 %v1004_v18  ;;  %v921_v48 = vmul.f32 %v1442_v27, %v920_v47 }
 0x516   : > { %660 = vst.msk [vmem:[#allocation4 + $0x8] sm:$0xff] %vm327_vm0, %v659_v37 }
 0x517   : > { %v2005_v38 = vld [vmem:[#allocation3] sm:$0xff] }
 0x518   : > { %1445 = vrcp.f32 %v2005_v38 }
 0x51d   : > { %v1006_v0 = vld [vmem:[#allocation4 + $0x8] sm:$0xff] }
 0x51e   : > { %v1444_v39 = vpop.eup %1443 }
 0x51f   : > { %1010 = vperm.xlu0 %1425, %v1444_v39  }
 0x522   : > { %v1446_v40 = vpop.eup %1445 }
 0x523   : > { %996 = vperm.xlu1 %1426, %v1446_v40  }
 0x55c   : > { %v761_v44 = vpop.xlane.xlu0 %760 }
 0x55d   : > { %v762_v45 = vadd.f32 %v761_v44, %v758_v43 }
 0x55f   : > { %763 = vst.msk [vmem:[#allocation3 + $0x10] sm:$0xff] %vm318_vm2, %v762_v45 }
 0x566   : > { %v1018_v46 = vld [vmem:[#allocation3 + $0x10] sm:$0xff] }
 0x567   : > { %1447 = vrcp.f32 %v1018_v46 }
 0x568   : > { %1449 = vlog2.f32 %v1004_v18 }
 0x571   : > { %v1448_v49 = vpop.eup %1447  ;;  %v924_v50 = vpop.xlane.xlu0 %923 }
 0x572   : > { %v925_v51 = vadd.f32 %v924_v50, %v921_v48  ;;  %1024 = vperm.xlu1 %1426, %v1448_v49   ;;  %v1450_v57 = vpop.eup %1449 }
 0x573   : > { %v1015_v58 = vmul.f32 0.6931472, %v1450_v57 }
 0x574   : > { %926 = vst.msk [vmem:[#allocation3 + $0x18] sm:$0xff] %vm318_vm2, %v925_v51 }
 0x575   : > { %v1016_v60 = vadd.f32 %v1015_v58, %v1005_v59 }
 0x577   : > { %v1017_v62 = vmul.f32 1.4427, %v1016_v60 }
 0x579   : > { %v492_v53 = vpop.permute.xlu0 %491 }
 0x57a   : > { %v494_v54 = vmul.f32 %v492_v53, %v488_v52 }
 0x57b   : > { %v1032_v55 = vld [vmem:[#allocation3 + $0x18] sm:$0xff] }
 0x57c   : > { %v495_v56 = vadd.f32 %v494_v54, %v1975_v41  ;;  %1451 = vrcp.f32 %v1032_v55  ;;  %v819_v41 = vpop.permute.xlu1 %818 }
 0x57d   : > { %v982_v63 = vpop.permute.xlu0 %981  ;;  %v821_v4 = vmul.f32 %v819_v41, %v815_v3  ;;  %1453 = vlog2.f32 %v1032_v55 }
 0x57e   : > { %496 = vst.msk [vmem:[#allocation4] sm:$0xff] %vm327_vm0, %v495_v56  ;;  %v984_v11 = vmul.f32 %v982_v63, %v978_v10  ;;  %1455 = vlog2.f32 %v1018_v46 }
 0x57f   : > { %1457 = vlog2.f32 %v2005_v38 }
 0x585   : > { %v992_v37 = vld [vmem:[#allocation4] sm:$0xff] }
 0x586   : > { %v1452_v61 = vpop.eup %1451 }
 0x587   : > { %1038 = vperm.xlu0 %1425, %v1452_v61   ;;  %v1454_v20 = vpop.eup %1453 }
 0x588   : > { %v1043_v22 = vmul.f32 0.6931472, %v1454_v20  ;;  %v1456_v29 = vpop.eup %1455 }
 0x589   : > { %v1029_v30 = vmul.f32 0.6931472, %v1456_v29  ;;  %v1458_v14 = vpop.eup %1457 }
 0x58a   : > { %v1044_v27 = vadd.f32 %v1043_v22, %v1033_v25  ;;  %v1001_v18 = vmul.f32 0.6931472, %v1458_v14 }
 0x58b   : > { %1065 = vrot.lane.b32.xlu0 %v1017_v62, %s1647_s14  ;;  %v1030_v35 = vadd.f32 %v1029_v30, %v1019_v33 }
 0x58c   : > { %v1045_v28 = vmul.f32 1.4427, %v1044_v27  ;;  %v1002_v44 = vadd.f32 %v1001_v18, %v991_v42 }
 0x58d   : > { %v1031_v36 = vmul.f32 1.4427, %v1030_v35 }
 0x58e   : > { %v1003_v48 = vmul.f32 1.4427, %v1002_v44 }
 0x59e   : > { %v1011_v1 = vpop.permute.xlu0 %1010 }
 0x59f   : > { %v1013_v2 = vmul.f32 %v1011_v1, %v1006_v0 }
 0x5a1   : > { %1047 = vrot.lane.b32.xlu1 %v1013_v2, %s1646_s29 }
 0x5a2   : > { %v997_v21 = vpop.permute.xlu1 %996 }
 0x5a3   : > { %v999_v40 = vmul.f32 %v997_v21, %v992_v37 }
 0x5af   : > { %v808_v5 = vpop.f32.mrb[8].mxu1 }
 0x5b0   : > { %v822_v6 = vadd.f32 %v821_v4, %v808_v5  ;;  %v1330_v7 = vpop.f32.mrb[9].mxu1 }
 0x5b1   : > { %v811_v8 = vpop.f32.mrb[10].mxu1 }
 0x5b2   : > { %823 = vst.msk [vmem:[#allocation4 + $0x10] sm:$0xff] %vm327_vm0, %v822_v6  ;;  %v1331_v9 = vpop.f32.mrb[11].mxu1 }
 0x5b8   : > { %v971_v12 = vpop.f32.mrb[8].mxu0 }
 0x5b9   : > { %v985_v13 = vadd.f32 %v984_v11, %v971_v12  ;;  %v1341_v15 = vpop.f32.mrb[9].mxu0  ;;  %v1020_v23 = vld [vmem:[#allocation4 + $0x10] sm:$0xff] }
 0x5ba   : > { %v974_v16 = vpop.f32.mrb[10].mxu0 }
 0x5bb   : > { %986 = vst.msk [vmem:[#allocation4 + $0x18] sm:$0xff] %vm327_vm0, %v985_v13  ;;  %v1342_v19 = vpop.f32.mrb[11].mxu0 }
 0x5c2   : > { %v1034_v31 = vld [vmem:[#allocation4 + $0x18] sm:$0xff] }
 0x5f1   : > { %v1025_v24 = vpop.permute.xlu1 %1024 }
 0x5f2   : > { %v1027_v26 = vmul.f32 %v1025_v24, %v1020_v23 }
 0x5f4   : > { %1051 = vrot.lane.b32.xlu0 %v1027_v26, %s1645_s5 }
 0x5f8   : > { %1073 = vrot.lane.b32.xlu0 %v1045_v28, %s1648_s11 }
 0x606   : > { %v1039_v32 = vpop.permute.xlu0 %1038 }
 0x607   : > { %v1041_v34 = vmul.f32 %v1039_v32, %v1034_v31 }
 0x609   : > { %1055 = vrot.lane.b32.xlu1 %v1041_v34, %s1642_s21 }
 0x60a   : > { %v1066_v17 = vpop.permute.xlu0 %1065 }
 0x60d   : > { %1069 = vrot.lane.b32.xlu1 %v1031_v36, %s1649_s13 }
 0x613   : > { %v1048_v39 = vpop.permute.xlu1 %1047 }
 0x614   : > { %v1058_v38 = vsel %vm327_vm0, %v999_v40, %v1048_v39 }
 0x666   : > { %v1052_v43 = vpop.permute.xlu0 %1051 }
 0x667   : > { %v1060_v45 = vsel %vm1059_vm5, %v1058_v38, %v1052_v43 }
 0x67b   : > { %v1056_v46 = vpop.permute.xlu1 %1055 }
 0x67c   : > { %v1062_v47 = vsel %vm1061_vm6, %v1060_v45, %v1056_v46 }
 0x67d   : > { %1063 = vst [vmem:[%s302_s7] sm:$0xff] %v1062_v47 }
 0x67e   : > { %1562 = shalt.err (!%p1559_p11)
}
 0x67f   : > { %s1563_s25 = scalar_lea.hbm %s2028_s10, 128  ;;  %s1567_s27 = scalar_lea.hbm %s2089_s3, 256 }
 0x680   : > { %p1564_p2 = scmp.ne.s32.totalorder %s2028_s10, %s1563_s25  ;;  %p1568_p3 = scmp.lt.u32.totalorder %s2028_s10, %s2089_s3 }
 0x681   : > { %p1569_p0 = scmp.lt.u32.totalorder %s1567_s27, %s1563_s25  ;;  %p1571_p10 = scmp.lt.u32.totalorder %s1563_s25, %s2028_s10 }
 0x682   : > { %p1565_p5 = pnand %p1564_p2, %p2118_p12 }
 0x683   : > { %p1570_p4 = por %p1569_p0, %p1568_p3 }
 0x684   : > { %p1566_p7 = pneg %p1565_p5 }
 0x685   : > { %p1572_p1 = por %p1571_p10, %p1570_p4 }
 0x687   : > { %p1573_p8 = pnand %p1572_p1, %p1566_p7 }
 0x689   : > { %1576 = shalt.err (!%p1573_p8)
}
 0x68a   : > { %1349 = dma.vmem_to_hbm [thread:$0]  (%p2118_p12), %s2030_s23, 128, %s2028_s10, %s1084_s12   ;;  %v1076_v49 = vsel %vm318_vm2, %v1003_v48, %v1066_v17  ;;  %vm1081_vm9 = vcmask 31744   ;;  %v1070_v50 = vpop.permute.xlu1 %1069  ;;  %v1074_v51 = vpop.permute.xlu0 %1073 }
 0x68b   : > { %s312_s13 = scalar_lea.vmem %s2090_s4, %s1266_s18  ;;  %v1078_v52 = vsel %vm1077_vm7, %v1076_v49, %v1070_v50 }
 0x68c   : > { %v1080_v53 = vsel %vm1079_vm8, %v1078_v52, %v1074_v51 }
 0x68d   : > { %1082 = vst.msk [vmem:[%s312_s13] sm:$0xff] %vm1081_vm9, %v1080_v53 }
 0x68e PF: > { %s2119_s28 = sld [smem:[#allocation16_spill]]  ;;  %s1116_s1 = sand.u32 1, %s1615_s15  }
 0x68f   : > { %p2120_p12 = scmp.ne.s32.totalorder %s2107_s30, 0  ;;  %s1117_s26 = scalar_lea.sflag [#allocation7], %s1116_s1 }
 0x694   : > { %p2121_p9 = scmp.ge.s32.totalorder %s2119_s28, 2 }
 0x696   : > { %p1362_p6 = pnand %p2121_p9, %p2120_p12 }
 0x698   : > { %1610 = dma.done.wait (!%p1362_p6), %s1117_s26, 128  }
 0x699   : > { %1612 = vsyncadd (!%p1362_p6), %s1117_s26, 4294967168  ;;  %s24_s20 = sadd.s32 1, %s2119_s28   ;;  %s2122_s7 = sld [smem:[#allocation18_spill]] }
 0x69a   : > { %p21_p13 = scmp.ge.s32.totalorder %s24_s20, 4   ;;  %s2123_s18 = sld [smem:[#allocation15_spill]] }
 0x69b   : > { %s2124_s19 = sld [smem:[#allocation17_spill]]  ;;  %s2125_s15 = smov %s1619_s16 }
 0x69c   : > { %s2126_s16 = smov %s1623_s17  ;;  %23 = sbr.rel (!%p21_p13) target bundleno = 10 (0xa), region = 130 }
 0x69f   : > { %s2127_s17 = smov %s2122_s7 }
 0x6a3   :  { %1129 = vsyncpa [#allocation6], 1 }
 0x6a4   :  { %1131 = vsyncpa [#allocation6 + $0x1], 1 }
 0x6a5   :  { %1132 = vsyncpa [#allocation9], 1 }
 0x6a6   :  { %1134 = vsyncpa [#allocation9 + $0x1], 1 }
 0x6a7   :  { %1135 = vsyncpa [#allocation7], 1 }
 0x6a8   :  { %1137 = vsyncpa [#allocation7 + $0x1], 1 }

</bundles_post_ra>
